<compile_context>
chip_gen: v7x
topology: tpu7x:2x2x1
jax: 0.10.0
libtpu: 0.0.40
codegen_flags: <defaults>
</compile_context>

<pallas_src>
import functools

import numpy as np
import jax
import jax.numpy as jnp
from jax.experimental import pallas as pl
from jax.experimental.pallas import tpu as pltpu


# ----------------------------- fused encoder kernel ---------------------------

def _layer_norm(v, gamma, beta, eps):
    mu = jnp.mean(v, axis=-1, keepdims=True)
    var = jnp.mean((v - mu) ** 2, axis=-1, keepdims=True)
    return (v - mu) * jax.lax.rsqrt(var + eps) * gamma + beta


def _encoder_kernel(src_ref, mask_ref, w_emb_ref, pos_ref, ln0_g_ref, ln0_b_ref,
                    wq_ref, wk_ref, wv_ref, wo_ref, ln1_g_ref, ln1_b_ref,
                    w1_ref, b1_ref, w2_ref, b2_ref, ln2_g_ref, ln2_b_ref,
                    o_ref, x_scratch,
                    *, n_layers, L, D, H, dk, dv, eps):
    f32 = jnp.float32
    bf16 = jnp.bfloat16

    # ---- src embedding (Linear, bias=False): one (1,P)@(P,L*D) MXU matmul -----
    e = jnp.dot(src_ref[...].astype(bf16), w_emb_ref[...],
                preferred_element_type=f32)                      # (1, L*D)

    # De-interleave the single embedding row into token-major (L, D) layout.
    # Runs ONCE per grid step, off the per-layer hot path.
    for tl in range(L):
        x_scratch[tl:tl + 1, :] = e[:, tl * D:(tl + 1) * D]

    # dropout (eval mode: identity) + positional encoding + embedding LayerNorm
    # TODO(synk): dropout layers (p=0.1) are implemented as identity (eval-mode semantics).
    x = _layer_norm(x_scratch[...] + pos_ref[...],
                    ln0_g_ref[...], ln0_b_ref[...], eps)         # (L, D)

    # Additive attention-mask bias, hoisted out of the layer loop (select -> add).
    bias = jnp.where(mask_ref[...] == 0.0, -1e9, 0.0).astype(f32)   # (1, L), keys masked
    bias_hll = jnp.broadcast_to(bias, (H, L, L))                    # (H, L, L)

    # ---- encoder layers (post-LN), unrolled; everything stays on-chip ---------
    for li in range(n_layers):
        wq = wq_ref[li]                       # (H, D, dk) bf16, 1/sqrt(dk) folded
        wk = wk_ref[li]                       # (H, D, dk) bf16
        wv = wv_ref[li]                       # (H, D, dv) bf16
        wo = wo_ref[li]                       # (H, dv, D) bf16 (fc, bias=False)
        g1, be1 = ln1_g_ref[li], ln1_b_ref[li]
        fw1, fb1 = w1_ref[li], b1_ref[li]
        fw2, fb2 = w2_ref[li], b2_ref[li]
        g2, be2 = ln2_g_ref[li], ln2_b_ref[li]

        # -- multi-head self-attention, batched over heads (no per-head slicing)
        residual = x
        xb = jnp.broadcast_to(x.astype(bf16)[None], (H, L, D))       # (H, L, D)
        q = jnp.einsum('hld,hdk->hlk', xb, wq, preferred_element_type=f32)  # (H, L, dk)
        k = jnp.einsum('hld,hdk->hlk', xb, wk, preferred_element_type=f32)  # (H, L, dk)
        v = jnp.einsum('hld,hdk->hlk', xb, wv, preferred_element_type=f32)  # (H, L, dv)

        s = jnp.einsum('hld,hmd->hlm', q, k, preferred_element_type=f32)    # (H, L, L)
        s = s + bias_hll                                                     # masked_fill
        s = s - jnp.max(s, axis=-1, keepdims=True)
        p = jnp.exp(s)
        p = p * pl.reciprocal(jnp.sum(p, axis=-1, keepdims=True), approx=True)

        ctx = jnp.einsum('hlm,hmv->hlv', p, v, preferred_element_type=f32)   # (H, L, dv)
        o3 = jnp.einsum('hlv,hvd->hld', ctx.astype(bf16), wo,
                        preferred_element_type=f32)                          # (H, L, D)
        o = o3[0]
        for hi in range(1, H):                                               # sum over heads
            o = o + o3[hi]
        x = _layer_norm(o + residual, g1, be1, eps)

        # -- position-wise feed-forward
        residual = x
        hid = jnp.maximum(
            jnp.dot(x.astype(bf16), fw1, preferred_element_type=f32) + fb1, 0.0)
        ff = jnp.dot(hid.astype(bf16), fw2, preferred_element_type=f32) + fb2
        x = _layer_norm(ff + residual, g2, be2, eps)

    o_ref[...] = x


# ----------------------------- wrapper -----------------------------------------

def _resident_spec(a):
    nd = a.ndim
    return pl.BlockSpec(a.shape, lambda b, _nd=nd: (0,) * _nd)


def encoder_forward(params, src_seq, src_mask):
    cfg = params["cfg"]
    B, P = src_seq.shape
    L, D = cfg["n_embeddings"], cfg["embedding_dim"]
    H, dk, dv = cfg["n_head"], cfg["d_k"], cfg["d_v"]
    n_layers = cfg["n_layers"]

    # keep batch out of the last-two dims so blocked specs satisfy tiling rules
    src3 = src_seq.reshape(B, 1, P).astype(jnp.float32)
    mask3 = src_mask.reshape(B, 1, L).astype(jnp.float32)    # 1 = attend, 0 = masked

    resident = (params["w_emb"], params["pos"], params["ln_g"], params["ln_b"],
                params["wq"], params["wk"], params["wv"], params["wo"],
                params["ln1_g"], params["ln1_b"],
                params["w1"], params["b1"], params["w2"], params["b2"],
                params["ln2_g"], params["ln2_b"])
    operands = (src3, mask3) + resident

    in_specs = [pl.BlockSpec((None, 1, P), lambda b: (b, 0, 0)),
                pl.BlockSpec((None, 1, L), lambda b: (b, 0, 0))]
    in_specs += [_resident_spec(a) for a in resident]

    kern = functools.partial(_encoder_kernel, n_layers=n_layers, L=L, D=D,
                             H=H, dk=dk, dv=dv, eps=1e-6)

    # scoped VMEM limit sized from the actual operand set (all-layers resident)
    operand_bytes = sum(int(np.prod(a.shape)) * jnp.dtype(a.dtype).itemsize
                        for a in operands)
    vmem_bytes = int(min(4 * operand_bytes + (8 << 20), 64 << 20))

    out = pl.pallas_call(
        kern,
        out_shape=jax.ShapeDtypeStruct((B, L, D), jnp.float32),
        grid=(B,),
        in_specs=in_specs,
        out_specs=pl.BlockSpec((None, L, D), lambda b: (b, 0, 0)),
        scratch_shapes=[pltpu.VMEM((L, D), jnp.float32)],   # de-interleaved embeddings
        compiler_params=pltpu.CompilerParams(
            dimension_semantics=("parallel",),              # 2 TCs on v7x split batches
            vmem_limit_bytes=vmem_bytes),
    )(*operands)
    return out


# ----------------------------- parameter setup ---------------------------------

def sinusoid_table(n_position, d_hid):
    pos = np.arange(n_position)[:, None].astype(np.float64)
    j = np.arange(d_hid)[None, :]
    angle = pos / np.power(10000, 2 * (j // 2) / d_hid)
    tab = np.zeros((n_position, d_hid), dtype=np.float64)
    tab[:, 0::2] = np.sin(angle[:, 0::2])
    tab[:, 1::2] = np.cos(angle[:, 1::2])
    return jnp.asarray(tab, dtype=jnp.float32)


def init_params(key, *, n_embeddings, embedding_dim, n_layers, n_head,
                d_k, d_v, d_model, d_inner, n_position):
    assert d_model == embedding_dim
    bf16 = jnp.bfloat16

    def nrm(k, shape, scale=0.05):
        return scale * jax.random.normal(k, shape, dtype=jnp.float32)

    keys = jax.random.split(key, 1 + 8 * n_layers)
    ki = iter(keys)

    params = {
        "cfg": dict(n_embeddings=n_embeddings, embedding_dim=embedding_dim,
                    n_layers=n_layers, n_head=n_head, d_k=d_k, d_v=d_v),
        # weights stored (in, out); PyTorch Linear computes x @ W.T with W (out, in)
        "w_emb": nrm(next(ki), (n_position, n_embeddings * embedding_dim)).astype(bf16),
        "pos": sinusoid_table(n_position, embedding_dim)[:n_embeddings],   # (L, D) f32
        "ln_g": jnp.ones((1, d_model), jnp.float32),
        "ln_b": jnp.zeros((1, d_model), jnp.float32),
    }

    wq, wk, wv, wo = [], [], [], []
    ln1g, ln1b, ln2g, ln2b = [], [], [], []
    w1, b1, w2, b2 = [], [], [], []
    for _ in range(n_layers):
        # per-head weight stacks so the kernel can use batched (head-major) einsums
        wq.append((nrm(next(ki), (n_head, d_model, d_k)) / np.sqrt(d_k)).astype(bf16))
        wk.append(nrm(next(ki), (n_head, d_model, d_k)).astype(bf16))
        wv.append(nrm(next(ki), (n_head, d_model, d_v)).astype(bf16))
        wo.append(nrm(next(ki), (n_head, d_v, d_model)).astype(bf16))     # fc, bias=False
        ln1g.append(jnp.ones((1, d_model), jnp.float32))
        ln1b.append(jnp.zeros((1, d_model), jnp.float32))
        w1.append(nrm(next(ki), (d_model, d_inner)).astype(bf16))
        b1.append(nrm(next(ki), (1, d_inner)))
        w2.append(nrm(next(ki), (d_inner, d_model)).astype(bf16))
        b2.append(nrm(next(ki), (1, d_model)))
        ln2g.append(jnp.ones((1, d_model), jnp.float32))
        ln2b.append(jnp.zeros((1, d_model), jnp.float32))

    params.update(
        wq=jnp.stack(wq), wk=jnp.stack(wk), wv=jnp.stack(wv), wo=jnp.stack(wo),
        ln1_g=jnp.stack(ln1g), ln1_b=jnp.stack(ln1b),
        w1=jnp.stack(w1), b1=jnp.stack(b1), w2=jnp.stack(w2), b2=jnp.stack(b2),
        ln2_g=jnp.stack(ln2g), ln2_b=jnp.stack(ln2b))
    return params


# ----------------------------- main ---------------------------------------------

if __name__ == "__main__":
    # small config consistent with the module defaults (n_position=9)
    B = 2
    n_position = 9
    n_embeddings = 8          # sequence length after .view(-1, n_embeddings, embedding_dim)
    embedding_dim = d_model = 32
    n_layers = 2
    n_head = 4
    d_k = d_v = 8
    d_inner = 64

    key = jax.random.PRNGKey(0)
    k_par, k_seq = jax.random.split(key)
    params = init_params(k_par, n_embeddings=n_embeddings, embedding_dim=embedding_dim,
                         n_layers=n_layers, n_head=n_head, d_k=d_k, d_v=d_v,
                         d_model=d_model, d_inner=d_inner, n_position=n_position)

    src_seq = jax.random.normal(k_seq, (B, n_position), dtype=jnp.float32)
    # padding mask (B, 1, L): 1 = attend, 0 = masked (masked_fill with -1e9)
    src_mask = jnp.ones((B, 1, n_embeddings), jnp.float32)
    src_mask = src_mask.at[1, 0, 6:].set(0.0)

    fwd = jax.jit(lambda seq, mask: encoder_forward(params, seq, mask))
    out = fwd(src_seq, src_mask)
    jax.block_until_ready(out)
    assert out.shape == (B, n_embeddings, embedding_dim)
    assert bool(jnp.all(jnp.isfinite(out)))
    print("KERNEL_OK")
</pallas_src>

<mosaic_0001>
module attributes {stable_mosaic.version = 11 : i64} {
  func.func @_encoder_kernel(%arg0: i32, %arg1: memref<1x1x9xf32, #tpu.memory_space<vmem>>, %arg2: memref<1x1x8xf32, #tpu.memory_space<vmem>>, %arg3: memref<9x256xbf16, #tpu.memory_space<vmem>>, %arg4: memref<8x32xf32, #tpu.memory_space<vmem>>, %arg5: memref<1x32xf32, #tpu.memory_space<vmem>>, %arg6: memref<1x32xf32, #tpu.memory_space<vmem>>, %arg7: memref<2x4x32x8xbf16, #tpu.memory_space<vmem>>, %arg8: memref<2x4x32x8xbf16, #tpu.memory_space<vmem>>, %arg9: memref<2x4x32x8xbf16, #tpu.memory_space<vmem>>, %arg10: memref<2x4x8x32xbf16, #tpu.memory_space<vmem>>, %arg11: memref<2x1x32xf32, #tpu.memory_space<vmem>>, %arg12: memref<2x1x32xf32, #tpu.memory_space<vmem>>, %arg13: memref<2x32x64xbf16, #tpu.memory_space<vmem>>, %arg14: memref<2x1x64xf32, #tpu.memory_space<vmem>>, %arg15: memref<2x64x32xbf16, #tpu.memory_space<vmem>>, %arg16: memref<2x1x32xf32, #tpu.memory_space<vmem>>, %arg17: memref<2x1x32xf32, #tpu.memory_space<vmem>>, %arg18: memref<2x1x32xf32, #tpu.memory_space<vmem>>, %arg19: memref<1x8x32xf32, #tpu.memory_space<vmem>>, %arg20: memref<8x32xf32, #tpu.memory_space<vmem>>) attributes {dimension_semantics = [#tpu.dimension_semantics<parallel>], iteration_bounds = array<i64: 2>, scalar_prefetch = 0 : i64, scratch_operands = 1 : i64, tpu.core_type = #tpu.core_type<tc>, window_params = [{transform_indices = @transform_0, window_bounds = array<i64: 1, 1, 9>}, {transform_indices = @transform_1, window_bounds = array<i64: 1, 1, 8>}, {pipeline_mode = #tpu.pipeline_mode<synchronous>, transform_indices = @transform_2, window_bounds = array<i64: 9, 256>}, {pipeline_mode = #tpu.pipeline_mode<synchronous>, transform_indices = @transform_3, window_bounds = array<i64: 8, 32>}, {pipeline_mode = #tpu.pipeline_mode<synchronous>, transform_indices = @transform_4, window_bounds = array<i64: 1, 32>}, {pipeline_mode = #tpu.pipeline_mode<synchronous>, transform_indices = @transform_5, window_bounds = array<i64: 1, 32>}, {pipeline_mode = #tpu.pipeline_mode<synchronous>, transform_indices = @transform_6, window_bounds = array<i64: 2, 4, 32, 8>}, {pipeline_mode = #tpu.pipeline_mode<synchronous>, transform_indices = @transform_7, window_bounds = array<i64: 2, 4, 32, 8>}, {pipeline_mode = #tpu.pipeline_mode<synchronous>, transform_indices = @transform_8, window_bounds = array<i64: 2, 4, 32, 8>}, {pipeline_mode = #tpu.pipeline_mode<synchronous>, transform_indices = @transform_9, window_bounds = array<i64: 2, 4, 8, 32>}, {pipeline_mode = #tpu.pipeline_mode<synchronous>, transform_indices = @transform_10, window_bounds = array<i64: 2, 1, 32>}, {pipeline_mode = #tpu.pipeline_mode<synchronous>, transform_indices = @transform_11, window_bounds = array<i64: 2, 1, 32>}, {pipeline_mode = #tpu.pipeline_mode<synchronous>, transform_indices = @transform_12, window_bounds = array<i64: 2, 32, 64>}, {pipeline_mode = #tpu.pipeline_mode<synchronous>, transform_indices = @transform_13, window_bounds = array<i64: 2, 1, 64>}, {pipeline_mode = #tpu.pipeline_mode<synchronous>, transform_indices = @transform_14, window_bounds = array<i64: 2, 64, 32>}, {pipeline_mode = #tpu.pipeline_mode<synchronous>, transform_indices = @transform_15, window_bounds = array<i64: 2, 1, 32>}, {pipeline_mode = #tpu.pipeline_mode<synchronous>, transform_indices = @transform_16, window_bounds = array<i64: 2, 1, 32>}, {pipeline_mode = #tpu.pipeline_mode<synchronous>, transform_indices = @transform_17, window_bounds = array<i64: 2, 1, 32>}, {transform_indices = @transform_18, window_bounds = array<i64: 1, 8, 32>}]} {
    %c0 = arith.constant 0 : index
    %c0_0 = arith.constant 0 : index
    %c0_1 = arith.constant 0 : index
    %0 = vector.load %arg1[%c0, %c0_0, %c0_1] : memref<1x1x9xf32, #tpu.memory_space<vmem>>, vector<1x1x9xf32>
    %1 = vector.shape_cast %0 : vector<1x1x9xf32> to vector<1x9xf32>
    %2 = arith.truncf %1 : vector<1x9xf32> to vector<1x9xbf16>
    %c0_2 = arith.constant 0 : index
    %c0_3 = arith.constant 0 : index
    %3 = vector.load %arg3[%c0_2, %c0_3] : memref<9x256xbf16, #tpu.memory_space<vmem>>, vector<9x256xbf16>
    %cst = arith.constant dense<0.000000e+00> : vector<1x256xf32>
    %4 = tpu.matmul %2, %3, %cst {dimension_numbers = #tpu.dot_dimension_numbers<[1], [0], [0], [1], [0, 0, 1, 1], [], []>} : vector<1x9xbf16>, vector<9x256xbf16>, vector<1x256xf32> -> vector<1x256xf32>
    %5 = vector.extract_strided_slice %4 {offsets = [0, 0], sizes = [1, 32], strides = [1, 1]} : vector<1x256xf32> to vector<1x32xf32>
    %c0_4 = arith.constant 0 : index
    %c0_5 = arith.constant 0 : index
    %6 = vector.load %arg20[%c0_4, %c0_5] : memref<8x32xf32, #tpu.memory_space<vmem>>, vector<1x32xf32>
    tpu.vector_store %arg20[%c0_4, %c0_5], %5 {strides = array<i32>} : memref<8x32xf32, #tpu.memory_space<vmem>>, vector<1x32xf32>,
    %7 = vector.extract_strided_slice %4 {offsets = [0, 32], sizes = [1, 32], strides = [1, 1]} : vector<1x256xf32> to vector<1x32xf32>
    %c1 = arith.constant 1 : index
    %c0_6 = arith.constant 0 : index
    %8 = vector.load %arg20[%c1, %c0_6] : memref<8x32xf32, #tpu.memory_space<vmem>>, vector<1x32xf32>
    tpu.vector_store %arg20[%c1, %c0_6], %7 {strides = array<i32>} : memref<8x32xf32, #tpu.memory_space<vmem>>, vector<1x32xf32>,
    %9 = vector.extract_strided_slice %4 {offsets = [0, 64], sizes = [1, 32], strides = [1, 1]} : vector<1x256xf32> to vector<1x32xf32>
    %c2 = arith.constant 2 : index
    %c0_7 = arith.constant 0 : index
    %10 = vector.load %arg20[%c2, %c0_7] : memref<8x32xf32, #tpu.memory_space<vmem>>, vector<1x32xf32>
    tpu.vector_store %arg20[%c2, %c0_7], %9 {strides = array<i32>} : memref<8x32xf32, #tpu.memory_space<vmem>>, vector<1x32xf32>,
    %11 = vector.extract_strided_slice %4 {offsets = [0, 96], sizes = [1, 32], strides = [1, 1]} : vector<1x256xf32> to vector<1x32xf32>
    %c3 = arith.constant 3 : index
    %c0_8 = arith.constant 0 : index
    %12 = vector.load %arg20[%c3, %c0_8] : memref<8x32xf32, #tpu.memory_space<vmem>>, vector<1x32xf32>
    tpu.vector_store %arg20[%c3, %c0_8], %11 {strides = array<i32>} : memref<8x32xf32, #tpu.memory_space<vmem>>, vector<1x32xf32>,
    %13 = vector.extract_strided_slice %4 {offsets = [0, 128], sizes = [1, 32], strides = [1, 1]} : vector<1x256xf32> to vector<1x32xf32>
    %c4 = arith.constant 4 : index
    %c0_9 = arith.constant 0 : index
    %14 = vector.load %arg20[%c4, %c0_9] : memref<8x32xf32, #tpu.memory_space<vmem>>, vector<1x32xf32>
    tpu.vector_store %arg20[%c4, %c0_9], %13 {strides = array<i32>} : memref<8x32xf32, #tpu.memory_space<vmem>>, vector<1x32xf32>,
    %15 = vector.extract_strided_slice %4 {offsets = [0, 160], sizes = [1, 32], strides = [1, 1]} : vector<1x256xf32> to vector<1x32xf32>
    %c5 = arith.constant 5 : index
    %c0_10 = arith.constant 0 : index
    %16 = vector.load %arg20[%c5, %c0_10] : memref<8x32xf32, #tpu.memory_space<vmem>>, vector<1x32xf32>
    tpu.vector_store %arg20[%c5, %c0_10], %15 {strides = array<i32>} : memref<8x32xf32, #tpu.memory_space<vmem>>, vector<1x32xf32>,
    %17 = vector.extract_strided_slice %4 {offsets = [0, 192], sizes = [1, 32], strides = [1, 1]} : vector<1x256xf32> to vector<1x32xf32>
    %c6 = arith.constant 6 : index
    %c0_11 = arith.constant 0 : index
    %18 = vector.load %arg20[%c6, %c0_11] : memref<8x32xf32, #tpu.memory_space<vmem>>, vector<1x32xf32>
    tpu.vector_store %arg20[%c6, %c0_11], %17 {strides = array<i32>} : memref<8x32xf32, #tpu.memory_space<vmem>>, vector<1x32xf32>,
    %19 = vector.extract_strided_slice %4 {offsets = [0, 224], sizes = [1, 32], strides = [1, 1]} : vector<1x256xf32> to vector<1x32xf32>
    %c7 = arith.constant 7 : index
    %c0_12 = arith.constant 0 : index
    %20 = vector.load %arg20[%c7, %c0_12] : memref<8x32xf32, #tpu.memory_space<vmem>>, vector<1x32xf32>
    tpu.vector_store %arg20[%c7, %c0_12], %19 {strides = array<i32>} : memref<8x32xf32, #tpu.memory_space<vmem>>, vector<1x32xf32>,
    %c0_13 = arith.constant 0 : index
    %c0_14 = arith.constant 0 : index
    %21 = vector.load %arg20[%c0_13, %c0_14] : memref<8x32xf32, #tpu.memory_space<vmem>>, vector<8x32xf32>
    %c0_15 = arith.constant 0 : index
    %c0_16 = arith.constant 0 : index
    %22 = vector.load %arg4[%c0_15, %c0_16] : memref<8x32xf32, #tpu.memory_space<vmem>>, vector<8x32xf32>
    %23 = arith.addf %21, %22 : vector<8x32xf32>
    %c0_17 = arith.constant 0 : index
    %c0_18 = arith.constant 0 : index
    %24 = vector.load %arg5[%c0_17, %c0_18] : memref<1x32xf32, #tpu.memory_space<vmem>>, vector<1x32xf32>
    %c0_19 = arith.constant 0 : index
    %c0_20 = arith.constant 0 : index
    %25 = vector.load %arg6[%c0_19, %c0_20] : memref<1x32xf32, #tpu.memory_space<vmem>>, vector<1x32xf32>
    %cst_21 = arith.constant dense<0.000000e+00> : vector<8xf32>
    %26 = vector.multi_reduction <add>, %23, %cst_21 [1] : vector<8x32xf32> to vector<8xf32>
    %27 = vector.shape_cast %26 : vector<8xf32> to vector<8x1xf32>
    %cst_22 = arith.constant 3.200000e+01 : f32
    %28 = vector.broadcast %cst_22 : f32 to vector<8x1xf32>
    %29 = arith.divf %27, %28 : vector<8x1xf32>
    %30 = vector.broadcast %29 : vector<8x1xf32> to vector<8x32xf32>
    %31 = arith.subf %23, %30 : vector<8x32xf32>
    %32 = arith.mulf %31, %31 : vector<8x32xf32>
    %cst_23 = arith.constant dense<0.000000e+00> : vector<8xf32>
    %33 = vector.multi_reduction <add>, %32, %cst_23 [1] : vector<8x32xf32> to vector<8xf32>
    %34 = vector.shape_cast %33 : vector<8xf32> to vector<8x1xf32>
    %cst_24 = arith.constant 3.200000e+01 : f32
    %35 = vector.broadcast %cst_24 : f32 to vector<8x1xf32>
    %36 = arith.divf %34, %35 : vector<8x1xf32>
    %37 = vector.broadcast %29 : vector<8x1xf32> to vector<8x32xf32>
    %38 = arith.subf %23, %37 : vector<8x32xf32>
    %cst_25 = arith.constant 9.99999997E-7 : f32
    %39 = vector.broadcast %cst_25 : f32 to vector<8x1xf32>
    %40 = arith.addf %36, %39 : vector<8x1xf32>
    %41 = math.rsqrt %40 : vector<8x1xf32>
    %42 = vector.broadcast %41 : vector<8x1xf32> to vector<8x32xf32>
    %43 = arith.mulf %38, %42 : vector<8x32xf32>
    %44 = vector.broadcast %24 : vector<1x32xf32> to vector<8x32xf32>
    %45 = arith.mulf %43, %44 : vector<8x32xf32>
    %46 = vector.broadcast %25 : vector<1x32xf32> to vector<8x32xf32>
    %47 = arith.addf %45, %46 : vector<8x32xf32>
    %c0_26 = arith.constant 0 : index
    %c0_27 = arith.constant 0 : index
    %c0_28 = arith.constant 0 : index
    %48 = vector.load %arg2[%c0_26, %c0_27, %c0_28] : memref<1x1x8xf32, #tpu.memory_space<vmem>>, vector<1x1x8xf32>
    %49 = vector.shape_cast %48 : vector<1x1x8xf32> to vector<1x8xf32>
    %cst_29 = arith.constant 0.000000e+00 : f32
    %50 = vector.broadcast %cst_29 : f32 to vector<1x8xf32>
    %51 = arith.cmpf oeq, %49, %50 : vector<1x8xf32>
    %cst_30 = arith.constant -1.000000e+09 : f32
    %cst_31 = arith.constant 0.000000e+00 : f32
    %52 = vector.broadcast %cst_30 : f32 to vector<1x8xf32>
    %53 = vector.broadcast %cst_31 : f32 to vector<1x8xf32>
    %54 = arith.select %51, %52, %53 : vector<1x8xi1>, vector<1x8xf32>
    %55 = vector.shape_cast %54 : vector<1x8xf32> to vector<1x1x8xf32>
    %56 = vector.broadcast %55 : vector<1x1x8xf32> to vector<4x8x8xf32>
    %c0_32 = arith.constant 0 : index
    %c0_33 = arith.constant 0 : index
    %c0_34 = arith.constant 0 : index
    %c0_35 = arith.constant 0 : index
    %57 = vector.load %arg7[%c0_32, %c0_33, %c0_34, %c0_35] : memref<2x4x32x8xbf16, #tpu.memory_space<vmem>>, vector<1x4x32x8xbf16>
    %58 = vector.shape_cast %57 : vector<1x4x32x8xbf16> to vector<4x32x8xbf16>
    %c0_36 = arith.constant 0 : index
    %c0_37 = arith.constant 0 : index
    %c0_38 = arith.constant 0 : index
    %c0_39 = arith.constant 0 : index
    %59 = vector.load %arg8[%c0_36, %c0_37, %c0_38, %c0_39] : memref<2x4x32x8xbf16, #tpu.memory_space<vmem>>, vector<1x4x32x8xbf16>
    %60 = vector.shape_cast %59 : vector<1x4x32x8xbf16> to vector<4x32x8xbf16>
    %c0_40 = arith.constant 0 : index
    %c0_41 = arith.constant 0 : index
    %c0_42 = arith.constant 0 : index
    %c0_43 = arith.constant 0 : index
    %61 = vector.load %arg9[%c0_40, %c0_41, %c0_42, %c0_43] : memref<2x4x32x8xbf16, #tpu.memory_space<vmem>>, vector<1x4x32x8xbf16>
    %62 = vector.shape_cast %61 : vector<1x4x32x8xbf16> to vector<4x32x8xbf16>
    %c0_44 = arith.constant 0 : index
    %c0_45 = arith.constant 0 : index
    %c0_46 = arith.constant 0 : index
    %c0_47 = arith.constant 0 : index
    %63 = vector.load %arg10[%c0_44, %c0_45, %c0_46, %c0_47] : memref<2x4x8x32xbf16, #tpu.memory_space<vmem>>, vector<1x4x8x32xbf16>
    %64 = vector.shape_cast %63 : vector<1x4x8x32xbf16> to vector<4x8x32xbf16>
    %c0_48 = arith.constant 0 : index
    %c0_49 = arith.constant 0 : index
    %c0_50 = arith.constant 0 : index
    %65 = vector.load %arg11[%c0_48, %c0_49, %c0_50] : memref<2x1x32xf32, #tpu.memory_space<vmem>>, vector<1x1x32xf32>
    %66 = vector.shape_cast %65 : vector<1x1x32xf32> to vector<1x32xf32>
    %c0_51 = arith.constant 0 : index
    %c0_52 = arith.constant 0 : index
    %c0_53 = arith.constant 0 : index
    %67 = vector.load %arg12[%c0_51, %c0_52, %c0_53] : memref<2x1x32xf32, #tpu.memory_space<vmem>>, vector<1x1x32xf32>
    %68 = vector.shape_cast %67 : vector<1x1x32xf32> to vector<1x32xf32>
    %c0_54 = arith.constant 0 : index
    %c0_55 = arith.constant 0 : index
    %c0_56 = arith.constant 0 : index
    %69 = vector.load %arg13[%c0_54, %c0_55, %c0_56] : memref<2x32x64xbf16, #tpu.memory_space<vmem>>, vector<1x32x64xbf16>
    %70 = vector.shape_cast %69 : vector<1x32x64xbf16> to vector<32x64xbf16>
    %c0_57 = arith.constant 0 : index
    %c0_58 = arith.constant 0 : index
    %c0_59 = arith.constant 0 : index
    %71 = vector.load %arg14[%c0_57, %c0_58, %c0_59] : memref<2x1x64xf32, #tpu.memory_space<vmem>>, vector<1x1x64xf32>
    %72 = vector.shape_cast %71 : vector<1x1x64xf32> to vector<1x64xf32>
    %c0_60 = arith.constant 0 : index
    %c0_61 = arith.constant 0 : index
    %c0_62 = arith.constant 0 : index
    %73 = vector.load %arg15[%c0_60, %c0_61, %c0_62] : memref<2x64x32xbf16, #tpu.memory_space<vmem>>, vector<1x64x32xbf16>
    %74 = vector.shape_cast %73 : vector<1x64x32xbf16> to vector<64x32xbf16>
    %c0_63 = arith.constant 0 : index
    %c0_64 = arith.constant 0 : index
    %c0_65 = arith.constant 0 : index
    %75 = vector.load %arg16[%c0_63, %c0_64, %c0_65] : memref<2x1x32xf32, #tpu.memory_space<vmem>>, vector<1x1x32xf32>
    %76 = vector.shape_cast %75 : vector<1x1x32xf32> to vector<1x32xf32>
    %c0_66 = arith.constant 0 : index
    %c0_67 = arith.constant 0 : index
    %c0_68 = arith.constant 0 : index
    %77 = vector.load %arg17[%c0_66, %c0_67, %c0_68] : memref<2x1x32xf32, #tpu.memory_space<vmem>>, vector<1x1x32xf32>
    %78 = vector.shape_cast %77 : vector<1x1x32xf32> to vector<1x32xf32>
    %c0_69 = arith.constant 0 : index
    %c0_70 = arith.constant 0 : index
    %c0_71 = arith.constant 0 : index
    %79 = vector.load %arg18[%c0_69, %c0_70, %c0_71] : memref<2x1x32xf32, #tpu.memory_space<vmem>>, vector<1x1x32xf32>
    %80 = vector.shape_cast %79 : vector<1x1x32xf32> to vector<1x32xf32>
    %81 = arith.truncf %47 : vector<8x32xf32> to vector<8x32xbf16>
    %82 = vector.shape_cast %81 : vector<8x32xbf16> to vector<1x8x32xbf16>
    %83 = vector.shape_cast %82 : vector<1x8x32xbf16> to vector<1x8x32xbf16>
    %84 = vector.broadcast %83 : vector<1x8x32xbf16> to vector<4x8x32xbf16>
    "tpu.trace_start"() <{level = 10 : i32, message = "hld,hdk->hlk"}> : () -> ()
    %cst_72 = arith.constant dense<0.000000e+00> : vector<4x8x8xf32>
    %85 = tpu.matmul %84, %58, %cst_72 {dimension_numbers = #tpu.dot_dimension_numbers<[2], [1], [1], [2], [0, 0, 0, 1, 1, 2], [0], [0]>} : vector<4x8x32xbf16>, vector<4x32x8xbf16>, vector<4x8x8xf32> -> vector<4x8x8xf32>
    %cst_73 = arith.constant dense<0.000000e+00> : vector<4x8x8xf32>
    %86 = tpu.matmul %84, %60, %cst_73 {dimension_numbers = #tpu.dot_dimension_numbers<[2], [1], [1], [2], [0, 0, 0, 1, 1, 2], [0], [0]>} : vector<4x8x32xbf16>, vector<4x32x8xbf16>, vector<4x8x8xf32> -> vector<4x8x8xf32>
    %cst_74 = arith.constant dense<0.000000e+00> : vector<4x8x8xf32>
    %87 = tpu.matmul %84, %62, %cst_74 {dimension_numbers = #tpu.dot_dimension_numbers<[2], [1], [1], [2], [0, 0, 0, 1, 1, 2], [0], [0]>} : vector<4x8x32xbf16>, vector<4x32x8xbf16>, vector<4x8x8xf32> -> vector<4x8x8xf32>
    "tpu.trace_stop"() : () -> ()
    "tpu.trace_start"() <{level = 10 : i32, message = "hld,hmd->hlm"}> : () -> ()
    %cst_75 = arith.constant dense<0.000000e+00> : vector<4x8x8xf32>
    %88 = tpu.matmul %85, %86, %cst_75 {dimension_numbers = #tpu.dot_dimension_numbers<[2], [2], [1], [1], [0, 0, 0, 1, 1, 1], [0], [0]>} : vector<4x8x8xf32>, vector<4x8x8xf32>, vector<4x8x8xf32> -> vector<4x8x8xf32>
    "tpu.trace_stop"() : () -> ()
    %89 = arith.addf %88, %56 : vector<4x8x8xf32>
    %cst_76 = arith.constant dense<0xFF800000> : vector<4x8xf32>
    %90 = vector.multi_reduction <maximumf>, %89, %cst_76 [2] : vector<4x8x8xf32> to vector<4x8xf32>
    %91 = vector.shape_cast %90 : vector<4x8xf32> to vector<4x8x1xf32>
    %92 = vector.broadcast %91 : vector<4x8x1xf32> to vector<4x8x8xf32>
    %93 = arith.subf %89, %92 : vector<4x8x8xf32>
    %94 = math.exp %93 : vector<4x8x8xf32>
    %cst_77 = arith.constant dense<0.000000e+00> : vector<4x8xf32>
    %95 = vector.multi_reduction <add>, %94, %cst_77 [2] : vector<4x8x8xf32> to vector<4x8xf32>
    %96 = vector.shape_cast %95 : vector<4x8xf32> to vector<4x8x1xf32>
    %97 = tpu.reciprocal %96 {approx = true} : vector<4x8x1xf32> -> vector<4x8x1xf32>
    %98 = vector.broadcast %97 : vector<4x8x1xf32> to vector<4x8x8xf32>
    %99 = arith.mulf %94, %98 : vector<4x8x8xf32>
    "tpu.trace_start"() <{level = 10 : i32, message = "hlm,hmv->hlv"}> : () -> ()
    %cst_78 = arith.constant dense<0.000000e+00> : vector<4x8x8xf32>
    %100 = tpu.matmul %99, %87, %cst_78 {dimension_numbers = #tpu.dot_dimension_numbers<[2], [1], [1], [2], [0, 0, 0, 1, 1, 2], [0], [0]>} : vector<4x8x8xf32>, vector<4x8x8xf32>, vector<4x8x8xf32> -> vector<4x8x8xf32>
    "tpu.trace_stop"() : () -> ()
    %101 = arith.truncf %100 : vector<4x8x8xf32> to vector<4x8x8xbf16>
    "tpu.trace_start"() <{level = 10 : i32, message = "hlv,hvd->hld"}> : () -> ()
    %cst_79 = arith.constant dense<0.000000e+00> : vector<4x8x32xf32>
    %102 = tpu.matmul %101, %64, %cst_79 {dimension_numbers = #tpu.dot_dimension_numbers<[2], [1], [1], [2], [0, 0, 0, 1, 1, 2], [0], [0]>} : vector<4x8x8xbf16>, vector<4x8x32xbf16>, vector<4x8x32xf32> -> vector<4x8x32xf32>
    "tpu.trace_stop"() : () -> ()
    %103 = vector.extract_strided_slice %102 {offsets = [0, 0, 0], sizes = [1, 8, 32], strides = [1, 1, 1]} : vector<4x8x32xf32> to vector<1x8x32xf32>
    %104 = vector.shape_cast %103 : vector<1x8x32xf32> to vector<8x32xf32>
    %105 = vector.extract_strided_slice %102 {offsets = [1, 0, 0], sizes = [1, 8, 32], strides = [1, 1, 1]} : vector<4x8x32xf32> to vector<1x8x32xf32>
    %106 = vector.shape_cast %105 : vector<1x8x32xf32> to vector<8x32xf32>
    %107 = arith.addf %104, %106 : vector<8x32xf32>
    %108 = vector.extract_strided_slice %102 {offsets = [2, 0, 0], sizes = [1, 8, 32], strides = [1, 1, 1]} : vector<4x8x32xf32> to vector<1x8x32xf32>
    %109 = vector.shape_cast %108 : vector<1x8x32xf32> to vector<8x32xf32>
    %110 = arith.addf %107, %109 : vector<8x32xf32>
    %111 = vector.extract_strided_slice %102 {offsets = [3, 0, 0], sizes = [1, 8, 32], strides = [1, 1, 1]} : vector<4x8x32xf32> to vector<1x8x32xf32>
    %112 = vector.shape_cast %111 : vector<1x8x32xf32> to vector<8x32xf32>
    %113 = arith.addf %110, %112 : vector<8x32xf32>
    %114 = arith.addf %113, %47 : vector<8x32xf32>
    %cst_80 = arith.constant dense<0.000000e+00> : vector<8xf32>
    %115 = vector.multi_reduction <add>, %114, %cst_80 [1] : vector<8x32xf32> to vector<8xf32>
    %116 = vector.shape_cast %115 : vector<8xf32> to vector<8x1xf32>
    %cst_81 = arith.constant 3.200000e+01 : f32
    %117 = vector.broadcast %cst_81 : f32 to vector<8x1xf32>
    %118 = arith.divf %116, %117 : vector<8x1xf32>
    %119 = vector.broadcast %118 : vector<8x1xf32> to vector<8x32xf32>
    %120 = arith.subf %114, %119 : vector<8x32xf32>
    %121 = arith.mulf %120, %120 : vector<8x32xf32>
    %cst_82 = arith.constant dense<0.000000e+00> : vector<8xf32>
    %122 = vector.multi_reduction <add>, %121, %cst_82 [1] : vector<8x32xf32> to vector<8xf32>
    %123 = vector.shape_cast %122 : vector<8xf32> to vector<8x1xf32>
    %cst_83 = arith.constant 3.200000e+01 : f32
    %124 = vector.broadcast %cst_83 : f32 to vector<8x1xf32>
    %125 = arith.divf %123, %124 : vector<8x1xf32>
    %126 = vector.broadcast %118 : vector<8x1xf32> to vector<8x32xf32>
    %127 = arith.subf %114, %126 : vector<8x32xf32>
    %cst_84 = arith.constant 9.99999997E-7 : f32
    %128 = vector.broadcast %cst_84 : f32 to vector<8x1xf32>
    %129 = arith.addf %125, %128 : vector<8x1xf32>
    %130 = math.rsqrt %129 : vector<8x1xf32>
    %131 = vector.broadcast %130 : vector<8x1xf32> to vector<8x32xf32>
    %132 = arith.mulf %127, %131 : vector<8x32xf32>
    %133 = vector.broadcast %66 : vector<1x32xf32> to vector<8x32xf32>
    %134 = arith.mulf %132, %133 : vector<8x32xf32>
    %135 = vector.broadcast %68 : vector<1x32xf32> to vector<8x32xf32>
    %136 = arith.addf %134, %135 : vector<8x32xf32>
    %137 = arith.truncf %136 : vector<8x32xf32> to vector<8x32xbf16>
    %cst_85 = arith.constant dense<0.000000e+00> : vector<8x64xf32>
    %138 = tpu.matmul %137, %70, %cst_85 {dimension_numbers = #tpu.dot_dimension_numbers<[1], [0], [0], [1], [0, 0, 1, 1], [], []>} : vector<8x32xbf16>, vector<32x64xbf16>, vector<8x64xf32> -> vector<8x64xf32>
    %139 = vector.broadcast %72 : vector<1x64xf32> to vector<8x64xf32>
    %140 = arith.addf %138, %139 : vector<8x64xf32>
    %cst_86 = arith.constant 0.000000e+00 : f32
    %141 = vector.broadcast %cst_86 : f32 to vector<8x64xf32>
    %142 = arith.maximumf %140, %141 : vector<8x64xf32>
    %143 = arith.truncf %142 : vector<8x64xf32> to vector<8x64xbf16>
    %cst_87 = arith.constant dense<0.000000e+00> : vector<8x32xf32>
    %144 = tpu.matmul %143, %74, %cst_87 {dimension_numbers = #tpu.dot_dimension_numbers<[1], [0], [0], [1], [0, 0, 1, 1], [], []>} : vector<8x64xbf16>, vector<64x32xbf16>, vector<8x32xf32> -> vector<8x32xf32>
    %145 = vector.broadcast %76 : vector<1x32xf32> to vector<8x32xf32>
    %146 = arith.addf %144, %145 : vector<8x32xf32>
    %147 = arith.addf %146, %136 : vector<8x32xf32>
    %cst_88 = arith.constant dense<0.000000e+00> : vector<8xf32>
    %148 = vector.multi_reduction <add>, %147, %cst_88 [1] : vector<8x32xf32> to vector<8xf32>
    %149 = vector.shape_cast %148 : vector<8xf32> to vector<8x1xf32>
    %cst_89 = arith.constant 3.200000e+01 : f32
    %150 = vector.broadcast %cst_89 : f32 to vector<8x1xf32>
    %151 = arith.divf %149, %150 : vector<8x1xf32>
    %152 = vector.broadcast %151 : vector<8x1xf32> to vector<8x32xf32>
    %153 = arith.subf %147, %152 : vector<8x32xf32>
    %154 = arith.mulf %153, %153 : vector<8x32xf32>
    %cst_90 = arith.constant dense<0.000000e+00> : vector<8xf32>
    %155 = vector.multi_reduction <add>, %154, %cst_90 [1] : vector<8x32xf32> to vector<8xf32>
    %156 = vector.shape_cast %155 : vector<8xf32> to vector<8x1xf32>
    %cst_91 = arith.constant 3.200000e+01 : f32
    %157 = vector.broadcast %cst_91 : f32 to vector<8x1xf32>
    %158 = arith.divf %156, %157 : vector<8x1xf32>
    %159 = vector.broadcast %151 : vector<8x1xf32> to vector<8x32xf32>
    %160 = arith.subf %147, %159 : vector<8x32xf32>
    %cst_92 = arith.constant 9.99999997E-7 : f32
    %161 = vector.broadcast %cst_92 : f32 to vector<8x1xf32>
    %162 = arith.addf %158, %161 : vector<8x1xf32>
    %163 = math.rsqrt %162 : vector<8x1xf32>
    %164 = vector.broadcast %163 : vector<8x1xf32> to vector<8x32xf32>
    %165 = arith.mulf %160, %164 : vector<8x32xf32>
    %166 = vector.broadcast %78 : vector<1x32xf32> to vector<8x32xf32>
    %167 = arith.mulf %165, %166 : vector<8x32xf32>
    %168 = vector.broadcast %80 : vector<1x32xf32> to vector<8x32xf32>
    %169 = arith.addf %167, %168 : vector<8x32xf32>
    %c1_93 = arith.constant 1 : index
    %c0_94 = arith.constant 0 : index
    %c0_95 = arith.constant 0 : index
    %c0_96 = arith.constant 0 : index
    %170 = vector.load %arg7[%c1_93, %c0_94, %c0_95, %c0_96] : memref<2x4x32x8xbf16, #tpu.memory_space<vmem>>, vector<1x4x32x8xbf16>
    %171 = vector.shape_cast %170 : vector<1x4x32x8xbf16> to vector<4x32x8xbf16>
    %c1_97 = arith.constant 1 : index
    %c0_98 = arith.constant 0 : index
    %c0_99 = arith.constant 0 : index
    %c0_100 = arith.constant 0 : index
    %172 = vector.load %arg8[%c1_97, %c0_98, %c0_99, %c0_100] : memref<2x4x32x8xbf16, #tpu.memory_space<vmem>>, vector<1x4x32x8xbf16>
    %173 = vector.shape_cast %172 : vector<1x4x32x8xbf16> to vector<4x32x8xbf16>
    %c1_101 = arith.constant 1 : index
    %c0_102 = arith.constant 0 : index
    %c0_103 = arith.constant 0 : index
    %c0_104 = arith.constant 0 : index
    %174 = vector.load %arg9[%c1_101, %c0_102, %c0_103, %c0_104] : memref<2x4x32x8xbf16, #tpu.memory_space<vmem>>, vector<1x4x32x8xbf16>
    %175 = vector.shape_cast %174 : vector<1x4x32x8xbf16> to vector<4x32x8xbf16>
    %c1_105 = arith.constant 1 : index
    %c0_106 = arith.constant 0 : index
    %c0_107 = arith.constant 0 : index
    %c0_108 = arith.constant 0 : index
    %176 = vector.load %arg10[%c1_105, %c0_106, %c0_107, %c0_108] : memref<2x4x8x32xbf16, #tpu.memory_space<vmem>>, vector<1x4x8x32xbf16>
    %177 = vector.shape_cast %176 : vector<1x4x8x32xbf16> to vector<4x8x32xbf16>
    %c1_109 = arith.constant 1 : index
    %c0_110 = arith.constant 0 : index
    %c0_111 = arith.constant 0 : index
    %178 = vector.load %arg11[%c1_109, %c0_110, %c0_111] : memref<2x1x32xf32, #tpu.memory_space<vmem>>, vector<1x1x32xf32>
    %179 = vector.shape_cast %178 : vector<1x1x32xf32> to vector<1x32xf32>
    %c1_112 = arith.constant 1 : index
    %c0_113 = arith.constant 0 : index
    %c0_114 = arith.constant 0 : index
    %180 = vector.load %arg12[%c1_112, %c0_113, %c0_114] : memref<2x1x32xf32, #tpu.memory_space<vmem>>, vector<1x1x32xf32>
    %181 = vector.shape_cast %180 : vector<1x1x32xf32> to vector<1x32xf32>
    %c1_115 = arith.constant 1 : index
    %c0_116 = arith.constant 0 : index
    %c0_117 = arith.constant 0 : index
    %182 = vector.load %arg13[%c1_115, %c0_116, %c0_117] : memref<2x32x64xbf16, #tpu.memory_space<vmem>>, vector<1x32x64xbf16>
    %183 = vector.shape_cast %182 : vector<1x32x64xbf16> to vector<32x64xbf16>
    %c1_118 = arith.constant 1 : index
    %c0_119 = arith.constant 0 : index
    %c0_120 = arith.constant 0 : index
    %184 = vector.load %arg14[%c1_118, %c0_119, %c0_120] : memref<2x1x64xf32, #tpu.memory_space<vmem>>, vector<1x1x64xf32>
    %185 = vector.shape_cast %184 : vector<1x1x64xf32> to vector<1x64xf32>
    %c1_121 = arith.constant 1 : index
    %c0_122 = arith.constant 0 : index
    %c0_123 = arith.constant 0 : index
    %186 = vector.load %arg15[%c1_121, %c0_122, %c0_123] : memref<2x64x32xbf16, #tpu.memory_space<vmem>>, vector<1x64x32xbf16>
    %187 = vector.shape_cast %186 : vector<1x64x32xbf16> to vector<64x32xbf16>
    %c1_124 = arith.constant 1 : index
    %c0_125 = arith.constant 0 : index
    %c0_126 = arith.constant 0 : index
    %188 = vector.load %arg16[%c1_124, %c0_125, %c0_126] : memref<2x1x32xf32, #tpu.memory_space<vmem>>, vector<1x1x32xf32>
    %189 = vector.shape_cast %188 : vector<1x1x32xf32> to vector<1x32xf32>
    %c1_127 = arith.constant 1 : index
    %c0_128 = arith.constant 0 : index
    %c0_129 = arith.constant 0 : index
    %190 = vector.load %arg17[%c1_127, %c0_128, %c0_129] : memref<2x1x32xf32, #tpu.memory_space<vmem>>, vector<1x1x32xf32>
    %191 = vector.shape_cast %190 : vector<1x1x32xf32> to vector<1x32xf32>
    %c1_130 = arith.constant 1 : index
    %c0_131 = arith.constant 0 : index
    %c0_132 = arith.constant 0 : index
    %192 = vector.load %arg18[%c1_130, %c0_131, %c0_132] : memref<2x1x32xf32, #tpu.memory_space<vmem>>, vector<1x1x32xf32>
    %193 = vector.shape_cast %192 : vector<1x1x32xf32> to vector<1x32xf32>
    %194 = arith.truncf %169 : vector<8x32xf32> to vector<8x32xbf16>
    %195 = vector.shape_cast %194 : vector<8x32xbf16> to vector<1x8x32xbf16>
    %196 = vector.shape_cast %195 : vector<1x8x32xbf16> to vector<1x8x32xbf16>
    %197 = vector.broadcast %196 : vector<1x8x32xbf16> to vector<4x8x32xbf16>
    "tpu.trace_start"() <{level = 10 : i32, message = "hld,hdk->hlk"}> : () -> ()
    %cst_133 = arith.constant dense<0.000000e+00> : vector<4x8x8xf32>
    %198 = tpu.matmul %197, %171, %cst_133 {dimension_numbers = #tpu.dot_dimension_numbers<[2], [1], [1], [2], [0, 0, 0, 1, 1, 2], [0], [0]>} : vector<4x8x32xbf16>, vector<4x32x8xbf16>, vector<4x8x8xf32> -> vector<4x8x8xf32>
    %cst_134 = arith.constant dense<0.000000e+00> : vector<4x8x8xf32>
    %199 = tpu.matmul %197, %173, %cst_134 {dimension_numbers = #tpu.dot_dimension_numbers<[2], [1], [1], [2], [0, 0, 0, 1, 1, 2], [0], [0]>} : vector<4x8x32xbf16>, vector<4x32x8xbf16>, vector<4x8x8xf32> -> vector<4x8x8xf32>
    %cst_135 = arith.constant dense<0.000000e+00> : vector<4x8x8xf32>
    %200 = tpu.matmul %197, %175, %cst_135 {dimension_numbers = #tpu.dot_dimension_numbers<[2], [1], [1], [2], [0, 0, 0, 1, 1, 2], [0], [0]>} : vector<4x8x32xbf16>, vector<4x32x8xbf16>, vector<4x8x8xf32> -> vector<4x8x8xf32>
    "tpu.trace_stop"() : () -> ()
    "tpu.trace_start"() <{level = 10 : i32, message = "hld,hmd->hlm"}> : () -> ()
    %cst_136 = arith.constant dense<0.000000e+00> : vector<4x8x8xf32>
    %201 = tpu.matmul %198, %199, %cst_136 {dimension_numbers = #tpu.dot_dimension_numbers<[2], [2], [1], [1], [0, 0, 0, 1, 1, 1], [0], [0]>} : vector<4x8x8xf32>, vector<4x8x8xf32>, vector<4x8x8xf32> -> vector<4x8x8xf32>
    "tpu.trace_stop"() : () -> ()
    %202 = arith.addf %201, %56 : vector<4x8x8xf32>
    %cst_137 = arith.constant dense<0xFF800000> : vector<4x8xf32>
    %203 = vector.multi_reduction <maximumf>, %202, %cst_137 [2] : vector<4x8x8xf32> to vector<4x8xf32>
    %204 = vector.shape_cast %203 : vector<4x8xf32> to vector<4x8x1xf32>
    %205 = vector.broadcast %204 : vector<4x8x1xf32> to vector<4x8x8xf32>
    %206 = arith.subf %202, %205 : vector<4x8x8xf32>
    %207 = math.exp %206 : vector<4x8x8xf32>
    %cst_138 = arith.constant dense<0.000000e+00> : vector<4x8xf32>
    %208 = vector.multi_reduction <add>, %207, %cst_138 [2] : vector<4x8x8xf32> to vector<4x8xf32>
    %209 = vector.shape_cast %208 : vector<4x8xf32> to vector<4x8x1xf32>
    %210 = tpu.reciprocal %209 {approx = true} : vector<4x8x1xf32> -> vector<4x8x1xf32>
    %211 = vector.broadcast %210 : vector<4x8x1xf32> to vector<4x8x8xf32>
    %212 = arith.mulf %207, %211 : vector<4x8x8xf32>
    "tpu.trace_start"() <{level = 10 : i32, message = "hlm,hmv->hlv"}> : () -> ()
    %cst_139 = arith.constant dense<0.000000e+00> : vector<4x8x8xf32>
    %213 = tpu.matmul %212, %200, %cst_139 {dimension_numbers = #tpu.dot_dimension_numbers<[2], [1], [1], [2], [0, 0, 0, 1, 1, 2], [0], [0]>} : vector<4x8x8xf32>, vector<4x8x8xf32>, vector<4x8x8xf32> -> vector<4x8x8xf32>
    "tpu.trace_stop"() : () -> ()
    %214 = arith.truncf %213 : vector<4x8x8xf32> to vector<4x8x8xbf16>
    "tpu.trace_start"() <{level = 10 : i32, message = "hlv,hvd->hld"}> : () -> ()
    %cst_140 = arith.constant dense<0.000000e+00> : vector<4x8x32xf32>
    %215 = tpu.matmul %214, %177, %cst_140 {dimension_numbers = #tpu.dot_dimension_numbers<[2], [1], [1], [2], [0, 0, 0, 1, 1, 2], [0], [0]>} : vector<4x8x8xbf16>, vector<4x8x32xbf16>, vector<4x8x32xf32> -> vector<4x8x32xf32>
    "tpu.trace_stop"() : () -> ()
    %216 = vector.extract_strided_slice %215 {offsets = [0, 0, 0], sizes = [1, 8, 32], strides = [1, 1, 1]} : vector<4x8x32xf32> to vector<1x8x32xf32>
    %217 = vector.shape_cast %216 : vector<1x8x32xf32> to vector<8x32xf32>
    %218 = vector.extract_strided_slice %215 {offsets = [1, 0, 0], sizes = [1, 8, 32], strides = [1, 1, 1]} : vector<4x8x32xf32> to vector<1x8x32xf32>
    %219 = vector.shape_cast %218 : vector<1x8x32xf32> to vector<8x32xf32>
    %220 = arith.addf %217, %219 : vector<8x32xf32>
    %221 = vector.extract_strided_slice %215 {offsets = [2, 0, 0], sizes = [1, 8, 32], strides = [1, 1, 1]} : vector<4x8x32xf32> to vector<1x8x32xf32>
    %222 = vector.shape_cast %221 : vector<1x8x32xf32> to vector<8x32xf32>
    %223 = arith.addf %220, %222 : vector<8x32xf32>
    %224 = vector.extract_strided_slice %215 {offsets = [3, 0, 0], sizes = [1, 8, 32], strides = [1, 1, 1]} : vector<4x8x32xf32> to vector<1x8x32xf32>
    %225 = vector.shape_cast %224 : vector<1x8x32xf32> to vector<8x32xf32>
    %226 = arith.addf %223, %225 : vector<8x32xf32>
    %227 = arith.addf %226, %169 : vector<8x32xf32>
    %cst_141 = arith.constant dense<0.000000e+00> : vector<8xf32>
    %228 = vector.multi_reduction <add>, %227, %cst_141 [1] : vector<8x32xf32> to vector<8xf32>
    %229 = vector.shape_cast %228 : vector<8xf32> to vector<8x1xf32>
    %cst_142 = arith.constant 3.200000e+01 : f32
    %230 = vector.broadcast %cst_142 : f32 to vector<8x1xf32>
    %231 = arith.divf %229, %230 : vector<8x1xf32>
    %232 = vector.broadcast %231 : vector<8x1xf32> to vector<8x32xf32>
    %233 = arith.subf %227, %232 : vector<8x32xf32>
    %234 = arith.mulf %233, %233 : vector<8x32xf32>
    %cst_143 = arith.constant dense<0.000000e+00> : vector<8xf32>
    %235 = vector.multi_reduction <add>, %234, %cst_143 [1] : vector<8x32xf32> to vector<8xf32>
    %236 = vector.shape_cast %235 : vector<8xf32> to vector<8x1xf32>
    %cst_144 = arith.constant 3.200000e+01 : f32
    %237 = vector.broadcast %cst_144 : f32 to vector<8x1xf32>
    %238 = arith.divf %236, %237 : vector<8x1xf32>
    %239 = vector.broadcast %231 : vector<8x1xf32> to vector<8x32xf32>
    %240 = arith.subf %227, %239 : vector<8x32xf32>
    %cst_145 = arith.constant 9.99999997E-7 : f32
    %241 = vector.broadcast %cst_145 : f32 to vector<8x1xf32>
    %242 = arith.addf %238, %241 : vector<8x1xf32>
    %243 = math.rsqrt %242 : vector<8x1xf32>
    %244 = vector.broadcast %243 : vector<8x1xf32> to vector<8x32xf32>
    %245 = arith.mulf %240, %244 : vector<8x32xf32>
    %246 = vector.broadcast %179 : vector<1x32xf32> to vector<8x32xf32>
    %247 = arith.mulf %245, %246 : vector<8x32xf32>
    %248 = vector.broadcast %181 : vector<1x32xf32> to vector<8x32xf32>
    %249 = arith.addf %247, %248 : vector<8x32xf32>
    %250 = arith.truncf %249 : vector<8x32xf32> to vector<8x32xbf16>
    %cst_146 = arith.constant dense<0.000000e+00> : vector<8x64xf32>
    %251 = tpu.matmul %250, %183, %cst_146 {dimension_numbers = #tpu.dot_dimension_numbers<[1], [0], [0], [1], [0, 0, 1, 1], [], []>} : vector<8x32xbf16>, vector<32x64xbf16>, vector<8x64xf32> -> vector<8x64xf32>
    %252 = vector.broadcast %185 : vector<1x64xf32> to vector<8x64xf32>
    %253 = arith.addf %251, %252 : vector<8x64xf32>
    %cst_147 = arith.constant 0.000000e+00 : f32
    %254 = vector.broadcast %cst_147 : f32 to vector<8x64xf32>
    %255 = arith.maximumf %253, %254 : vector<8x64xf32>
    %256 = arith.truncf %255 : vector<8x64xf32> to vector<8x64xbf16>
    %cst_148 = arith.constant dense<0.000000e+00> : vector<8x32xf32>
    %257 = tpu.matmul %256, %187, %cst_148 {dimension_numbers = #tpu.dot_dimension_numbers<[1], [0], [0], [1], [0, 0, 1, 1], [], []>} : vector<8x64xbf16>, vector<64x32xbf16>, vector<8x32xf32> -> vector<8x32xf32>
    %258 = vector.broadcast %189 : vector<1x32xf32> to vector<8x32xf32>
    %259 = arith.addf %257, %258 : vector<8x32xf32>
    %260 = arith.addf %259, %249 : vector<8x32xf32>
    %cst_149 = arith.constant dense<0.000000e+00> : vector<8xf32>
    %261 = vector.multi_reduction <add>, %260, %cst_149 [1] : vector<8x32xf32> to vector<8xf32>
    %262 = vector.shape_cast %261 : vector<8xf32> to vector<8x1xf32>
    %cst_150 = arith.constant 3.200000e+01 : f32
    %263 = vector.broadcast %cst_150 : f32 to vector<8x1xf32>
    %264 = arith.divf %262, %263 : vector<8x1xf32>
    %265 = vector.broadcast %264 : vector<8x1xf32> to vector<8x32xf32>
    %266 = arith.subf %260, %265 : vector<8x32xf32>
    %267 = arith.mulf %266, %266 : vector<8x32xf32>
    %cst_151 = arith.constant dense<0.000000e+00> : vector<8xf32>
    %268 = vector.multi_reduction <add>, %267, %cst_151 [1] : vector<8x32xf32> to vector<8xf32>
    %269 = vector.shape_cast %268 : vector<8xf32> to vector<8x1xf32>
    %cst_152 = arith.constant 3.200000e+01 : f32
    %270 = vector.broadcast %cst_152 : f32 to vector<8x1xf32>
    %271 = arith.divf %269, %270 : vector<8x1xf32>
    %272 = vector.broadcast %264 : vector<8x1xf32> to vector<8x32xf32>
    %273 = arith.subf %260, %272 : vector<8x32xf32>
    %cst_153 = arith.constant 9.99999997E-7 : f32
    %274 = vector.broadcast %cst_153 : f32 to vector<8x1xf32>
    %275 = arith.addf %271, %274 : vector<8x1xf32>
    %276 = math.rsqrt %275 : vector<8x1xf32>
    %277 = vector.broadcast %276 : vector<8x1xf32> to vector<8x32xf32>
    %278 = arith.mulf %273, %277 : vector<8x32xf32>
    %279 = vector.broadcast %191 : vector<1x32xf32> to vector<8x32xf32>
    %280 = arith.mulf %278, %279 : vector<8x32xf32>
    %281 = vector.broadcast %193 : vector<1x32xf32> to vector<8x32xf32>
    %282 = arith.addf %280, %281 : vector<8x32xf32>
    %c0_154 = arith.constant 0 : index
    %c0_155 = arith.constant 0 : index
    %c0_156 = arith.constant 0 : index
    %283 = vector.load %arg19[%c0_154, %c0_155, %c0_156] : memref<1x8x32xf32, #tpu.memory_space<vmem>>, vector<1x8x32xf32>
    %284 = vector.shape_cast %283 : vector<1x8x32xf32> to vector<8x32xf32>
    %285 = vector.shape_cast %282 : vector<8x32xf32> to vector<1x8x32xf32>
    tpu.vector_store %arg19[%c0_154, %c0_155, %c0_156], %285 {strides = array<i32>} : memref<1x8x32xf32, #tpu.memory_space<vmem>>, vector<1x8x32xf32>,
    return
  }
  func.func @transform_0(%arg0: i32) -> (i32, i32, i32) {
    %c0_i32 = arith.constant 0 : i32
    %c0_i32_0 = arith.constant 0 : i32
    %c0_i32_1 = arith.constant 0 : i32
    return %arg0, %c0_i32, %c0_i32_0 : i32, i32, i32
  }
  func.func @transform_1(%arg0: i32) -> (i32, i32, i32) {
    %c0_i32 = arith.constant 0 : i32
    %c0_i32_0 = arith.constant 0 : i32
    %c0_i32_1 = arith.constant 0 : i32
    return %arg0, %c0_i32, %c0_i32_0 : i32, i32, i32
  }
  func.func @transform_2(%arg0: i32) -> (i32, i32) {
    %c0_i32 = arith.constant 0 : i32
    %c0_i32_0 = arith.constant 0 : i32
    %c0_i32_1 = arith.constant 0 : i32
    return %c0_i32, %c0_i32_0 : i32, i32
  }
  func.func @transform_3(%arg0: i32) -> (i32, i32) {
    %c0_i32 = arith.constant 0 : i32
    %c0_i32_0 = arith.constant 0 : i32
    %c0_i32_1 = arith.constant 0 : i32
    return %c0_i32, %c0_i32_0 : i32, i32
  }
  func.func @transform_4(%arg0: i32) -> (i32, i32) {
    %c0_i32 = arith.constant 0 : i32
    %c0_i32_0 = arith.constant 0 : i32
    %c0_i32_1 = arith.constant 0 : i32
    return %c0_i32, %c0_i32_0 : i32, i32
  }
  func.func @transform_5(%arg0: i32) -> (i32, i32) {
    %c0_i32 = arith.constant 0 : i32
    %c0_i32_0 = arith.constant 0 : i32
    %c0_i32_1 = arith.constant 0 : i32
    return %c0_i32, %c0_i32_0 : i32, i32
  }
  func.func @transform_6(%arg0: i32) -> (i32, i32, i32, i32) {
    %c0_i32 = arith.constant 0 : i32
    %c0_i32_0 = arith.constant 0 : i32
    %c0_i32_1 = arith.constant 0 : i32
    %c0_i32_2 = arith.constant 0 : i32
    %c0_i32_3 = arith.constant 0 : i32
    return %c0_i32, %c0_i32_0, %c0_i32_1, %c0_i32_2 : i32, i32, i32, i32
  }
  func.func @transform_7(%arg0: i32) -> (i32, i32, i32, i32) {
    %c0_i32 = arith.constant 0 : i32
    %c0_i32_0 = arith.constant 0 : i32
    %c0_i32_1 = arith.constant 0 : i32
    %c0_i32_2 = arith.constant 0 : i32
    %c0_i32_3 = arith.constant 0 : i32
    return %c0_i32, %c0_i32_0, %c0_i32_1, %c0_i32_2 : i32, i32, i32, i32
  }
  func.func @transform_8(%arg0: i32) -> (i32, i32, i32, i32) {
    %c0_i32 = arith.constant 0 : i32
    %c0_i32_0 = arith.constant 0 : i32
    %c0_i32_1 = arith.constant 0 : i32
    %c0_i32_2 = arith.constant 0 : i32
    %c0_i32_3 = arith.constant 0 : i32
    return %c0_i32, %c0_i32_0, %c0_i32_1, %c0_i32_2 : i32, i32, i32, i32
  }
  func.func @transform_9(%arg0: i32) -> (i32, i32, i32, i32) {
    %c0_i32 = arith.constant 0 : i32
    %c0_i32_0 = arith.constant 0 : i32
    %c0_i32_1 = arith.constant 0 : i32
    %c0_i32_2 = arith.constant 0 : i32
    %c0_i32_3 = arith.constant 0 : i32
    return %c0_i32, %c0_i32_0, %c0_i32_1, %c0_i32_2 : i32, i32, i32, i32
  }
  func.func @transform_10(%arg0: i32) -> (i32, i32, i32) {
    %c0_i32 = arith.constant 0 : i32
    %c0_i32_0 = arith.constant 0 : i32
    %c0_i32_1 = arith.constant 0 : i32
    %c0_i32_2 = arith.constant 0 : i32
    return %c0_i32, %c0_i32_0, %c0_i32_1 : i32, i32, i32
  }
  func.func @transform_11(%arg0: i32) -> (i32, i32, i32) {
    %c0_i32 = arith.constant 0 : i32
    %c0_i32_0 = arith.constant 0 : i32
    %c0_i32_1 = arith.constant 0 : i32
    %c0_i32_2 = arith.constant 0 : i32
    return %c0_i32, %c0_i32_0, %c0_i32_1 : i32, i32, i32
  }
  func.func @transform_12(%arg0: i32) -> (i32, i32, i32) {
    %c0_i32 = arith.constant 0 : i32
    %c0_i32_0 = arith.constant 0 : i32
    %c0_i32_1 = arith.constant 0 : i32
    %c0_i32_2 = arith.constant 0 : i32
    return %c0_i32, %c0_i32_0, %c0_i32_1 : i32, i32, i32
  }
  func.func @transform_13(%arg0: i32) -> (i32, i32, i32) {
    %c0_i32 = arith.constant 0 : i32
    %c0_i32_0 = arith.constant 0 : i32
    %c0_i32_1 = arith.constant 0 : i32
    %c0_i32_2 = arith.constant 0 : i32
    return %c0_i32, %c0_i32_0, %c0_i32_1 : i32, i32, i32
  }
  func.func @transform_14(%arg0: i32) -> (i32, i32, i32) {
    %c0_i32 = arith.constant 0 : i32
    %c0_i32_0 = arith.constant 0 : i32
    %c0_i32_1 = arith.constant 0 : i32
    %c0_i32_2 = arith.constant 0 : i32
    return %c0_i32, %c0_i32_0, %c0_i32_1 : i32, i32, i32
  }
  func.func @transform_15(%arg0: i32) -> (i32, i32, i32) {
    %c0_i32 = arith.constant 0 : i32
    %c0_i32_0 = arith.constant 0 : i32
    %c0_i32_1 = arith.constant 0 : i32
    %c0_i32_2 = arith.constant 0 : i32
    return %c0_i32, %c0_i32_0, %c0_i32_1 : i32, i32, i32
  }
  func.func @transform_16(%arg0: i32) -> (i32, i32, i32) {
    %c0_i32 = arith.constant 0 : i32
    %c0_i32_0 = arith.constant 0 : i32
    %c0_i32_1 = arith.constant 0 : i32
    %c0_i32_2 = arith.constant 0 : i32
    return %c0_i32, %c0_i32_0, %c0_i32_1 : i32, i32, i32
  }
  func.func @transform_17(%arg0: i32) -> (i32, i32, i32) {
    %c0_i32 = arith.constant 0 : i32
    %c0_i32_0 = arith.constant 0 : i32
    %c0_i32_1 = arith.constant 0 : i32
    %c0_i32_2 = arith.constant 0 : i32
    return %c0_i32, %c0_i32_0, %c0_i32_1 : i32, i32, i32
  }
  func.func @transform_18(%arg0: i32) -> (i32, i32, i32) {
    %c0_i32 = arith.constant 0 : i32
    %c0_i32_0 = arith.constant 0 : i32
    %c0_i32_1 = arith.constant 0 : i32
    return %arg0, %c0_i32, %c0_i32_0 : i32, i32, i32
  }
}

</mosaic_0001>

<bundles_post_ra>
// kernel: _lambda_.1
= control target key start
LH: loop header
LB: loop body
LE: loop exit
PB: predicated region body
PF: predicated region fallthrough
CT: control target
= control target key end

     0   :  { %s6435_s0 = inlined_call_operand.vmem [shape: f32[2,1,9], index: 0, kind: input, shape index: {}]   ;;  %s6436_s1 = inlined_call_operand.vmem [shape: f32[2,1,8], index: 1, kind: input, shape index: {}]   ;;  %s6437_s2 = inlined_call_operand.vmem [shape: bf16[9,256], index: 2, kind: input, shape index: {}]   ;;  %s6438_s3 = inlined_call_operand.hbm [shape: f32[8,32], index: 3, kind: input, shape index: {}]   ;;  %s6439_s4 = inlined_call_operand.vmem [shape: f32[1,32], index: 4, kind: input, shape index: {}]   ;;  %s6440_s5 = inlined_call_operand.vmem [shape: f32[1,32], index: 5, kind: input, shape index: {}]   ;;  %s6441_s6 = inlined_call_operand.hbm [shape: bf16[2,4,32,8], index: 6, kind: input, shape index: {}]   ;;  %s6442_s7 = inlined_call_operand.hbm [shape: bf16[2,4,32,8], index: 7, kind: input, shape index: {}]   ;;  %s6443_s8 = inlined_call_operand.hbm [shape: bf16[2,4,32,8], index: 8, kind: input, shape index: {}]   ;;  %s6444_s9 = inlined_call_operand.hbm [shape: bf16[2,4,8,32], index: 9, kind: input, shape index: {}]   ;;  %s6445_s10 = inlined_call_operand.vmem [shape: f32[2,1,32], index: 10, kind: input, shape index: {}, may-alias: {10,16}]   ;;  %s6446_s11 = inlined_call_operand.vmem [shape: f32[2,1,32], index: 11, kind: input, shape index: {}, may-alias: {11,17}]   ;;  %s6447_s12 = inlined_call_operand.hbm [shape: bf16[2,32,64], index: 12, kind: input, shape index: {}]   ;;  %s6448_s13 = inlined_call_operand.hbm [shape: f32[2,1,64], index: 13, kind: input, shape index: {}]   ;;  %s6449_s14 = inlined_call_operand.vmem [shape: bf16[2,64,32], index: 14, kind: input, shape index: {}]   ;;  %s6450_s15 = inlined_call_operand.vmem [shape: f32[2,1,32], index: 15, kind: input, shape index: {}]   ;;  %s6451_s16 = inlined_call_operand.vmem [shape: f32[2,1,32], index: 16, kind: input, shape index: {}, may-alias: {10,16}]   ;;  %s6452_s17 = inlined_call_operand.vmem [shape: f32[2,1,32], index: 17, kind: input, shape index: {}, may-alias: {11,17}]   ;;  %s6453_s18 = inlined_call_operand.hbm [shape: f32[2,8,32], index: 18, kind: output, shape index: {}]  }
   0x1   :  { %6470 = sst [smem:[#allocation29_spill]] %s6435_s0 }
   0x2   :  { %6471 = sst [smem:[#allocation30_spill]] %s6436_s1 }
   0x3   :  { %6472 = sst [smem:[#allocation31_spill]] %s6437_s2 }
   0x4   :  { %6473 = sst [smem:[#allocation32_spill]] %s6441_s6 }
   0x5   :  { %6474 = sst [smem:[#allocation33_spill]] %s6451_s16 }
   0x6   :  { %6475 = sst [smem:[#allocation34_spill]] %s6452_s17 }
   0x7   :  { %6476 = sst [smem:[#allocation35_spill]] %s6453_s18 }
   0x8   :  { %23 = vsyncpa [#allocation4], 0 }
   0x9   :  { %24 = vsyncpa [#allocation7], 0 }
   0xa   :  { %25 = vsyncpa [#allocation10], 0 }
   0xb   :  { %26 = vsyncpa [#allocation13], 0 }
   0xc   :  { %27 = vsyncpa [#allocation5], 0 }
   0xd   :  { %29 = vsyncpa [#allocation5 + $0x1], 0  ;;  %s5714_s27 = smov 0   ;;  %s5716_s28 = smov 0  }
   0xe   :  { %s5718_s29 = smov 0   ;;  %s5720_s30 = smov 0  }
   0xf LB: > { %6477 = sst [smem:[#allocation21_spill]] %s5586_s27  ;;  %s5735_s0 = sadd.s32 4294967295, %s5598_s30   ;;  %s5598_s30 = sphi %s5720_s30, %s6513_s30   ;;  %s5594_s29 = sphi %s5718_s29, %s6516_s29   ;;  %s5590_s28 = sphi %s5716_s28, %s6515_s28   ;;  %s5586_s27 = sphi %s5714_s27, %s6514_s27  }
  0x10   : > { %6478 = sst [smem:[#allocation22_spill]] %s5590_s28  ;;  %s4429_s19 = sadd.s32 4294967294, %s5598_s30  }
  0x11   : > { %6479 = sst [smem:[#allocation23_spill]] %s5594_s29  ;;  %s5739_s1 = sadd.s32 1, %s5598_s30  }
  0x12   : > { %6480 = sst [smem:[#allocation24_spill]] %s5598_s30  ;;  %s430_s20 = sadd.s32 1, %s5594_s29 }
  0x13   : > { %6481 = sst [smem:[#allocation25_spill]] %s5739_s1  ;;  %s427_s21 = ssub.s32 %s5598_s30, %s5739_s1 }
  0x14   : > { %p440_p0 = scmp.ne.s32.totalorder %s5594_s29, %s5590_s28  ;;  %p428_p1 = scmp.eq.s32.totalorder %s427_s21, 0 }
  0x15   : > { %p441_p2 = scmp.eq.s32.totalorder %s5735_s0, 1  ;;  %p446_p3 = scmp.ne.s32.totalorder %s5590_s28, %s5586_s27 }
  0x16   : > { %p447_p4 = scmp.eq.s32.totalorder %s4429_s19, 1  ;;  %p4430_p7 = scmp.ge.s32.totalorder %s5598_s30, 1 }
  0x17   : > { %s5750_s22 = scalar_select %p428_p1, %s5594_s29, %s430_s20  }
  0x18   : > { %p5752_p5 = por %p441_p2, %p440_p0  ;;  %p5756_p6 = por %p447_p4, %p446_p3 }
  0x19   : > { %6482 = sst [smem:[#allocation26_spill]] %s5750_s22  ;;  %p454_p8 = scmp.lt.s32.totalorder %s5598_s30, 3 }
  0x1a   : > { %s6483_s2 = scalar_select %p5752_p5, 1, 0 }
  0x1b   : > { %s6485_s23 = scalar_select %p5756_p6, 1, 0 }
  0x1c   : > { %6484 = sst [smem:[#allocation27_spill]] %s6483_s2  ;;  %p6462_p9 = scmp.eq.s32.totalorder %s5735_s0, 0 }
  0x1d   : > { %6486 = sst [smem:[#allocation28_spill]] %s6485_s23  ;;  %p5763_p10 = pnand %p4430_p7, %p454_p8 }
  0x1e   : > { %s5600_s25 = smov [#allocation6]   ;;  %s5601_s20 = smov [#allocation9]  }
  0x1f   : > { %s6487_s24 = scalar_select %p5763_p10, 1, 0 }
  0x20   : > { %s486_s26 = sshll.u32 %s5600_s25, 4  ;;  %p5128_p11 = pneg %p5763_p10  ;;  %s5769_s26 = int_to_ptr.vmem [resolvable:$true] %s486_s26 }
  0x21   : > { %s512_s21 = sshll.u32 %s5601_s20, 4  ;;  %s5602_s22 = smov [#allocation12]   ;;  %s5777_s21 = int_to_ptr.vmem [resolvable:$true] %s512_s21 }
  0x22   : > { %p5773_p12 = pnand %p6462_p9, %p5128_p11  ;;  %s5779_s29 = sshll.u32 %s5602_s22, 4  ;;  %s545_s29 = int_to_ptr.vmem [resolvable:$true] %s5779_s29 }
  0x23   : > { %s6489_s6 = sld [smem:[#allocation32_spill]] }
  0x24   : > { %p5789_p0 = pneg %p5773_p12 }
  0x29   : > { %s5324_s25 = scalar_lea.hbm %s6489_s6, 2048 }
  0x2a   : > { %p5325_p13 = scmp.ne.s32.totalorder %s6489_s6, %s5324_s25  ;;  %p5331_p3 = scmp.lt.u32.totalorder %s5324_s25, %s6489_s6 }
  0x2c   : > { %p5327_p1 = pnand %p5789_p0, %p5325_p13 }
  0x2e   : > { %p5328_p2 = pneg %p5327_p1 }
  0x30   : > { %p5333_p4 = pnand %p5331_p3, %p5328_p2 }
  0x32   : > { %5336 = shalt.err (!%p5333_p4)
}
  0x33   : > { %s5337_s27 = scalar_lea.vmem %s5769_s26, 2048  ;;  %p5345_p9 = scmp.lt.s32.totalorder %s5769_s26, %s5769_s26 }
  0x34   : > { %p5338_p7 = scmp.ne.s32.totalorder %s5769_s26, %s5337_s27  ;;  %p5346_p6 = scmp.lt.s32.totalorder %s5337_s27, %s5337_s27 }
  0x36   : > { %p5340_p8 = pnand %p5338_p7, %p5789_p0  ;;  %p5347_p13 = por %p5346_p6, %p5345_p9 }
  0x38   : > { %p5341_p11 = pneg %p5340_p8 }
  0x3a   : > { %p5348_p1 = pnand %p5347_p13, %p5341_p11 }
  0x3c   : > { %5351 = shalt.err (!%p5348_p1)
}
  0x3d   : > { %s5603_s30 = smov 64   ;;  %s5604_s1 = smov 4  }
  0x3e   : > { %5134 = dma.hbm_to_vmem [thread:$0]  (!%p5773_p12), %s6489_s6, 2048, %s5769_s26, [#allocation7], %s5603_s30, %s5603_s30, %s5604_s1  }
  0x3f   : > { %s5352_s27 = scalar_lea.hbm %s6443_s8, 2048 }
  0x40   : > { %p5353_p6 = scmp.ne.s32.totalorder %s6443_s8, %s5352_s27  ;;  %p5359_p3 = scmp.lt.u32.totalorder %s5352_s27, %s6443_s8 }
  0x42   : > { %p5355_p9 = pnand %p5353_p6, %p5789_p0 }
  0x44   : > { %p5356_p2 = pneg %p5355_p9 }
  0x46   : > { %p5361_p4 = pnand %p5359_p3, %p5356_p2 }
  0x48   : > { %5364 = shalt.err (!%p5361_p4)
}
  0x49   : > { %s5365_s26 = scalar_lea.vmem %s5777_s21, 2048  ;;  %p5373_p13 = scmp.lt.s32.totalorder %s5777_s21, %s5777_s21 }
  0x4a   : > { %p5366_p7 = scmp.ne.s32.totalorder %s5777_s21, %s5365_s26  ;;  %p5374_p1 = scmp.lt.s32.totalorder %s5365_s26, %s5365_s26 }
  0x4c   : > { %p5368_p8 = pnand %p5366_p7, %p5789_p0  ;;  %p5375_p6 = por %p5374_p1, %p5373_p13 }
  0x4e   : > { %p5369_p11 = pneg %p5368_p8 }
  0x50   : > { %p5376_p9 = pnand %p5375_p6, %p5369_p11 }
  0x52   : > { %5379 = shalt.err (!%p5376_p9)
}
  0x53   : > { %5140 = dma.hbm_to_vmem [thread:$0]  (!%p5773_p12), %s6443_s8, 2048, %s5777_s21, [#allocation10], %s5603_s30, %s5603_s30, %s5604_s1  }
  0x54   : > { %s5380_s23 = scalar_lea.hbm %s6447_s12, 512 }
  0x55   : > { %p5381_p2 = scmp.ne.s32.totalorder %s6447_s12, %s5380_s23  ;;  %p5387_p7 = scmp.lt.u32.totalorder %s5380_s23, %s6447_s12 }
  0x57   : > { %p5383_p3 = pnand %p5381_p2, %p5789_p0 }
  0x59   : > { %p5384_p4 = pneg %p5383_p3 }
  0x5b   : > { %p5389_p8 = pnand %p5387_p7, %p5384_p4 }
  0x5d   : > { %5392 = shalt.err (!%p5389_p8)
}
  0x5e   : > { %s5393_s26 = scalar_lea.vmem %s545_s29, 512  ;;  %p5401_p6 = scmp.lt.s32.totalorder %s545_s29, %s545_s29 }
  0x5f   : > { %p5394_p11 = scmp.ne.s32.totalorder %s545_s29, %s5393_s26  ;;  %p5402_p9 = scmp.lt.s32.totalorder %s5393_s26, %s5393_s26 }
  0x61   : > { %p5396_p13 = pnand %p5394_p11, %p5789_p0  ;;  %p5403_p5 = por %p5402_p9, %p5401_p6 }
  0x63   : > { %p5397_p1 = pneg %p5396_p13 }
  0x65   : > { %p5404_p10 = pnand %p5403_p5, %p5397_p1 }
  0x67   : > { %5407 = shalt.err (!%p5404_p10)
}
  0x68   : > { %5146 = dma.hbm_to_vmem [thread:$0]  (!%p5773_p12), %s6447_s12, 512, %s545_s29, [#allocation13], %s5603_s30, %s5603_s30, %s5604_s1  }
  0x69   : > { %s5605_s17 = smov [#allocation3]   ;;  %s5606_s2 = smov [#allocation8]  }
  0x6a   : > { %s470_s28 = sshll.u32 %s5605_s17, 4  ;;  %s499_s23 = sshll.u32 %s5606_s2, 4  ;;  %s471_s28 = int_to_ptr.vmem [resolvable:$true] %s470_s28  ;;  %s500_s23 = int_to_ptr.vmem [resolvable:$true] %s499_s23 }
  0x6b   : > { %s5408_s22 = scalar_lea.hbm %s6438_s3, 128 }
  0x6c   : > { %p5409_p5 = scmp.ne.s32.totalorder %s6438_s3, %s5408_s22  ;;  %p5415_p3 = scmp.lt.u32.totalorder %s5408_s22, %s6438_s3 }
  0x6e   : > { %p5411_p10 = pnand %p5409_p5, %p5789_p0 }
  0x70   : > { %p5412_p2 = pneg %p5411_p10 }
  0x72   : > { %p5417_p4 = pnand %p5415_p3, %p5412_p2 }
  0x74   : > { %5420 = shalt.err (!%p5417_p4)
}
  0x75   : > { %s5421_s29 = scalar_lea.vmem %s471_s28, 128  ;;  %p5429_p13 = scmp.lt.s32.totalorder %s471_s28, %s471_s28 }
  0x76   : > { %p5422_p7 = scmp.ne.s32.totalorder %s471_s28, %s5421_s29  ;;  %p5430_p1 = scmp.lt.s32.totalorder %s5421_s29, %s5421_s29 }
  0x78   : > { %p5424_p8 = pnand %p5422_p7, %p5789_p0  ;;  %p5431_p6 = por %p5430_p1, %p5429_p13 }
  0x7a   : > { %p5425_p11 = pneg %p5424_p8 }
  0x7c   : > { %p5432_p9 = pnand %p5431_p6, %p5425_p11 }
  0x7e   : > { %5435 = shalt.err (!%p5432_p9)
}
  0x7f   : > { %5131 = dma.hbm_to_vmem [thread:$0]  (!%p5773_p12), %s6438_s3, 128, %s471_s28, [#allocation4]  }
  0x80   : > { %s5436_s25 = scalar_lea.hbm %s6442_s7, 2048 }
  0x81   : > { %p5437_p5 = scmp.ne.s32.totalorder %s6442_s7, %s5436_s25  ;;  %p5443_p3 = scmp.lt.u32.totalorder %s5436_s25, %s6442_s7 }
  0x83   : > { %p5439_p10 = pnand %p5437_p5, %p5789_p0 }
  0x85   : > { %p5440_p2 = pneg %p5439_p10 }
  0x87   : > { %p5445_p4 = pnand %p5443_p3, %p5440_p2 }
  0x89   : > { %5448 = shalt.err (!%p5445_p4)
}
  0x8a   : > { %s5449_s21 = scalar_lea.vmem %s500_s23, 2048  ;;  %p5457_p13 = scmp.lt.s32.totalorder %s500_s23, %s500_s23 }
  0x8b   : > { %p5450_p7 = scmp.ne.s32.totalorder %s500_s23, %s5449_s21  ;;  %p5458_p1 = scmp.lt.s32.totalorder %s5449_s21, %s5449_s21 }
  0x8d   : > { %p5452_p8 = pnand %p5450_p7, %p5789_p0  ;;  %p5459_p6 = por %p5458_p1, %p5457_p13 }
  0x8f   : > { %p5453_p11 = pneg %p5452_p8 }
  0x91   : > { %p5460_p9 = pnand %p5459_p6, %p5453_p11 }
  0x93   : > { %5463 = shalt.err (!%p5460_p9)
}
  0x94   : > { %5137 = dma.hbm_to_vmem [thread:$0]  (!%p5773_p12), %s6442_s7, 2048, %s500_s23, [#allocation7], %s5603_s30, %s5603_s30, %s5604_s1  }
  0x95   : > { %s5607_s16 = smov [#allocation11]   ;;  %s5608_s6 = smov [#allocation14]  }
  0x96   : > { %s525_s17 = sshll.u32 %s5607_s16, 4  ;;  %s557_s2 = sshll.u32 %s5608_s6, 4  ;;  %s526_s17 = int_to_ptr.vmem [resolvable:$true] %s525_s17  ;;  %s558_s2 = int_to_ptr.vmem [resolvable:$true] %s557_s2 }
  0x97   : > { %s5464_s22 = scalar_lea.hbm %s6444_s9, 512 }
  0x98   : > { %p5465_p5 = scmp.ne.s32.totalorder %s6444_s9, %s5464_s22  ;;  %p5471_p3 = scmp.lt.u32.totalorder %s5464_s22, %s6444_s9 }
  0x9a   : > { %p5467_p10 = pnand %p5465_p5, %p5789_p0 }
  0x9c   : > { %p5468_p2 = pneg %p5467_p10 }
  0x9e   : > { %p5473_p4 = pnand %p5471_p3, %p5468_p2 }
  0xa0   : > { %5476 = shalt.err (!%p5473_p4)
}
  0xa1   : > { %s5477_s23 = scalar_lea.vmem %s526_s17, 512  ;;  %p5485_p13 = scmp.lt.s32.totalorder %s526_s17, %s526_s17 }
  0xa2   : > { %p5478_p7 = scmp.ne.s32.totalorder %s526_s17, %s5477_s23  ;;  %p5486_p1 = scmp.lt.s32.totalorder %s5477_s23, %s5477_s23 }
  0xa4   : > { %p5480_p8 = pnand %p5478_p7, %p5789_p0  ;;  %p5487_p6 = por %p5486_p1, %p5485_p13 }
  0xa6   : > { %p5481_p11 = pneg %p5480_p8 }
  0xa8   : > { %p5488_p9 = pnand %p5487_p6, %p5481_p11 }
  0xaa   : > { %5491 = shalt.err (!%p5488_p9)
}
  0xab   : > { %5143 = dma.hbm_to_vmem [thread:$0]  (!%p5773_p12), %s6444_s9, 512, %s526_s17, [#allocation10], %s5603_s30, %s5603_s30, %s5604_s1  }
  0xac   : > { %s5492_s20 = scalar_lea.hbm %s6448_s13, 32 }
  0xad   : > { %p5493_p5 = scmp.ne.s32.totalorder %s6448_s13, %s5492_s20  ;;  %p5499_p3 = scmp.lt.u32.totalorder %s5492_s20, %s6448_s13 }
  0xaf   : > { %p5495_p10 = pnand %p5493_p5, %p5789_p0 }
  0xb1   : > { %p5496_p2 = pneg %p5495_p10 }
  0xb3   : > { %p5501_p4 = pnand %p5499_p3, %p5496_p2 }
  0xb5   : > { %5504 = shalt.err (!%p5501_p4)
}
  0xb6   : > { %s5505_s28 = scalar_lea.vmem %s558_s2, 32  ;;  %p5513_p13 = scmp.lt.s32.totalorder %s558_s2, %s558_s2 }
  0xb7   : > { %p5506_p7 = scmp.ne.s32.totalorder %s558_s2, %s5505_s28  ;;  %p5514_p1 = scmp.lt.s32.totalorder %s5505_s28, %s5505_s28 }
  0xb9   : > { %p5508_p8 = pnand %p5506_p7, %p5789_p0  ;;  %p5515_p6 = por %p5514_p1, %p5513_p13 }
  0xbb   : > { %p5509_p11 = pneg %p5508_p8 }
  0xbd   : > { %p5516_p9 = pnand %p5515_p6, %p5509_p11 }
  0xbf   : > { %5519 = shalt.err (!%p5516_p9)
}
  0xc0   : > { %s5609_s30 = smov 16   ;;  %s5610_s1 = smov 1  }
  0xc1   : > { %5149 = dma.hbm_to_vmem [thread:$0]  (!%p5773_p12), %s6448_s13, 32, %s558_s2, [#allocation13], %s5609_s30, %s5609_s30, %s5610_s1  }
  0xc2   : > { %p6491_p5 = scmp.ne.s32.totalorder %s6487_s24, 0 }
  0xc3   : > { %p6492_p10 = scmp.eq.s32.totalorder (!%p6491_p5), %s5735_s0, 0 }
  0xc4   : > { %597 = sbr.rel (%p6491_p5) target bundleno = 5434 (0x153a), region = 92 }
  0xcb   : > { %5565 = dma.done.wait (%p6492_p10), [#allocation4], 128   ;;  %p6493_p0 = pmov %p6492_p10 }
  0xcd   : > { %5567 = vsyncadd (%p6493_p0), [#allocation4], 4294967168  ;;  %p6494_p2 = pmov %p6493_p0 }
  0xce   : > { %p6495_p3 = pmov %p6493_p0 }
  0xcf   : > { %5569 = dma.done.wait (%p6494_p2), [#allocation7], 4096  }
  0xd0   : > { %5571 = vsyncadd (%p6495_p3), [#allocation7], 4294963200  ;;  %p6496_p4 = pmov %p6493_p0 }
  0xd1   : > { %p6497_p12 = pmov %p6493_p0 }
  0xd2   : > { %5573 = dma.done.wait (%p6496_p4), [#allocation10], 2560  }
  0xd3   : > { %5575 = vsyncadd (%p6497_p12), [#allocation10], 4294964736  ;;  %p6498_p7 = pmov %p6493_p0 }
  0xd4   : > { %p6499_p8 = pmov %p6493_p0 }
  0xd5   : > { %5577 = dma.done.wait (%p6498_p7), [#allocation13], 544  }
  0xd6   : > { %5579 = vsyncadd (%p6499_p8), [#allocation13], 4294966752  ;;  %vm699_vm0 = vcmask 1043456   ;;  %v5611_v0 = vmov 0   ;;  %p676_p11 = scmp.lt.s32.totalorder %s5735_s0, 1  ;;  %v5612_v1 = vmov 0.0  }
  0xd7   : > { %741 = vmatprep.mubr.bf16.mxu1 %v5611_v0  ;;  %4746 = vmatprep.subr.bf16.mxu0 %v5612_v1  ;;  %vm700_vm1 = vcmask 1044480   ;;  %v5613_v2 = vmov 65535   ;;  %s6500_s2 = sld [smem:[#allocation29_spill]]  ;;  %s6501_s25 = sld [smem:[#allocation31_spill]]  ;;  %vm695_vm2 = vcmask 72704   ;;  %vm750_vm3 = vcmask 253952  }
  0xd8   : > { %v701_v3 = vsel %vm699_vm0, 4294967295, %v5613_v2  ;;  %s5961_s18 = scalar_select %p676_p11, %s5735_s0, 1  ;;  %v780_v21 = vld [vmem:[#allocation3] sm:$0xff]  ;;  %vm784_vm4 = vcmask 261120   ;;  %v5222_v30 = vld [vmem:[#allocation6] sm:$0xff]   ;;  %v5223_v31 = vld [vmem:[#allocation6 + $0x10] sm:$0xff]  }
  0xd9   : > { %v702_v4 = vsel %vm700_vm1, %v701_v3, 0  ;;  %s5614_s27 = smov 32   ;;  %s5615_s26 = smov 96   ;;  %4747 = vmatpush3.bf16.msra.mxu0 %v5223_v31  ;;  %v5224_v32 = vld [vmem:[#allocation6 + $0x8] sm:$0xff]   ;;  %v5225_v33 = vld [vmem:[#allocation6 + $0x18] sm:$0xff]   ;;  %vm5617_vm5 = vmmov 0  }
  0xda   : > { %s5616_s21 = smov 64   ;;  %4748 = vmatprep.subr.bf16.mxu0 %v5612_v1  ;;  %4750 = vmatprep.mubr.msk.bf16.mxu0 %vm5617_vm5, %v5612_v1  ;;  %v4451_v38 = vld [vmem:[%s6439_s4] ss:$0 sm:$0xff]  ;;  %v5226_v43 = vld [vmem:[#allocation6 + $0x20] sm:$0xff]   ;;  %v5228_v46 = vld [vmem:[#allocation6 + $0x28] sm:$0xff]   ;;  %vm1520_vm6 = vcmask 64512  }
  0xdb   : > { %v4452_v40 = vld [vmem:[%s6440_s5] ss:$0 sm:$0xff]  ;;  %v5229_v47 = vld [vmem:[#allocation6 + $0x38] sm:$0xff]   ;;  %v5230_v48 = vld [vmem:[#allocation8] sm:$0xff]   ;;  %s6502_s19 = sld [smem:[#allocation30_spill]]  ;;  %vm2474_vm8 = vcmask 523264  }
  0xdc   : > { %v5227_v44 = vld [vmem:[#allocation6 + $0x30] sm:$0xff]   ;;  %v5232_v50 = vld [vmem:[#allocation8 + $0x8] sm:$0xff]   ;;  %v5233_v51 = vld [vmem:[#allocation8 + $0x18] sm:$0xff]   ;;  %s6504_s16 = sld [smem:[#allocation34_spill]]  ;;  %s4599_s30 = sshll.u32 %s5735_s0, 7 }
  0xdd   : > { %s678_s29 = scalar_lea.vmem %s6500_s2, %s5961_s18  ;;  %v5219_v5 = vld [vmem:[%s6501_s25 + $0x4] ss:$8 sps:$4 sm:$0x1f]   ;;  %v5221_v6 = vld [vmem:[%s6501_s25] ss:$8 sps:$4 sm:$0x1f]   ;;  %4749 = vmatpush3.bf16.msra.mxu0 %v5225_v33 }
  0xde   : > { %v683_v7 = vld [vmem:[%s678_s29] sm:$0x1]  ;;  %v707_v8 = vand.u32 %v5219_v5, %v702_v4  ;;  %v704_v9 = vand.u32 %v5221_v6, %v702_v4  ;;  %4762 = vmatprep.subr.bf16.mxu0 %v5612_v1  ;;  %v5234_v52 = vld [vmem:[#allocation8 + $0x20] sm:$0xff]   ;;  %v5236_v54 = vld [vmem:[#allocation8 + $0x28] sm:$0xff]   ;;  %s6505_s29 = sld [smem:[#allocation22_spill]]  ;;  %s6506_s22 = sld [smem:[#allocation27_spill]] }
  0xdf   : > { %v684_v10 = vpack.c.bf16 %v683_v7, %v683_v7  ;;  %v5231_v49 = vld [vmem:[#allocation8 + $0x10] sm:$0xff]   ;;  %v5237_v55 = vld [vmem:[#allocation8 + $0x38] sm:$0xff]   ;;  %v5238_v56 = vld [vmem:[#allocation9] sm:$0xff]   ;;  %s5618_s0 = smov [#allocation15]  }
  0xe0   : > { %709 = vmatprep.subr.bf16.mxu1 %v707_v8  ;;  %v5235_v53 = vld [vmem:[#allocation8 + $0x30] sm:$0xff]   ;;  %v5240_v58 = vld [vmem:[#allocation9 + $0x8] sm:$0xff]   ;;  %v5241_v59 = vld [vmem:[#allocation9 + $0x18] sm:$0xff]  }
  0xe1   : > { %710 = vmatpush1.bf16.msra.mxu1 %v704_v9  ;;  %v5239_v57 = vld [vmem:[#allocation9 + $0x10] sm:$0xff]   ;;  %v5242_v60 = vld [vmem:[#allocation9 + $0x20] sm:$0xff]   ;;  %v5244_v62 = vld [vmem:[#allocation9 + $0x28] sm:$0xff]   ;;  %s681_s2 = scalar_lea.vmem %s6502_s19, %s5961_s18  ;;  %s6507_s19 = sld [smem:[#allocation35_spill]] }
  0xe2   : > { %4738 = vmatprep.subr.bf16.mxu1 %v5612_v1  ;;  %v5243_v61 = vld [vmem:[#allocation9 + $0x30] sm:$0xff]   ;;  %v5245_v63 = vld [vmem:[#allocation9 + $0x38] sm:$0xff]  }
  0xe4   : > { %4450 = vmatmul.mubr.msk.bf16.vlgmr.msra.gmra.mrb[0].mxu1 %vm695_vm2, %v684_v10  ;;  %s673_s6 = sand.u32 1, %s6505_s29   ;;  %p6508_p1 = scmp.ne.s32.totalorder %s6506_s22, 0 }
  0xe5   : > { %4739 = vmatpush3.bf16.msra.mxu1 %v5222_v30  ;;  %4742 = vmatprep.mubr.msk.bf16.mxu1 %vm5617_vm5, %v5612_v1  ;;  %s4447_s20 = sshll.u32 %s673_s6, 3  ;;  %s4282_s29 = scalar_lea.sflag [#allocation5], %s673_s6 }
  0xe6   : > { %4740 = vmatprep.subr.bf16.mxu1 %v5612_v1  ;;  %s675_s1 = scalar_lea.vmem [#allocation15], %s4447_s20  ;;  %s5524_s20 = sshll.u32 %s5618_s0, 4  ;;  %s5525_s20 = int_to_ptr.vmem [resolvable:$false] %s5524_s20 }
  0xe7   : > { %s4295_s17 = sshll.u32 %s675_s1, 4  ;;  %s6392_s18 = scalar_lea.hbm %s6507_s19, %s4599_s30  ;;  %s6394_s17 = int_to_ptr.vmem [resolvable:$true] %s4295_s17 }
  0xe8   : > { %p5527_p5 = scmp.lt.s32.totalorder %s6394_s17, %s5525_s20 }
  0xe9   : > { %4741 = vmatpush3.bf16.msra.mxu1 %v5224_v32 }
  0xea   : > { %4754 = vmatprep.subr.bf16.mxu1 %v5612_v1 }
 0x1b7   : > { %v743_v11 = vpop.f32.mrb[0].mxu1 }
 0x1b8   : > { %751 = vst.msk [vmem:[#allocation2] sm:$0x1] %vm750_vm3, %v743_v11  ;;  %761 = vrot.lane.b32.xlu1 %v743_v11, %s5614_s27  ;;  %753 = vrot.lane.b32.xlu0 %v743_v11, %s5615_s26  ;;  %v745_v12 = vpop.f32.mrb[1].mxu1 }
 0x1b9   : > { %765 = vst.msk [vmem:[#allocation2 + $0x4] sm:$0x1] %vm750_vm3, %v745_v12  ;;  %v747_v13 = vpop.f32.mrb[2].mxu1 }
 0x1ba   : > { %v748_v14 = vpop.f32.mrb[3].mxu1 }
 0x1bc   : > { %757 = vrot.lane.b32.xlu0 %v743_v11, %s5616_s21  ;;  %767 = vrot.lane.b32.xlu1 %v745_v12, %s5615_s26  ;;  %s5526_s26 = scalar_lea.vmem %s5525_s20, 256 }
 0x1c0   : > { %771 = vrot.lane.b32.xlu0 %v745_v12, %s5616_s21  ;;  %775 = vrot.lane.b32.xlu1 %v745_v12, %s5614_s27  ;;  %s5520_s27 = scalar_lea.vmem %s6394_s17, 128 }
 0x1c1   : > { %p5521_p13 = scmp.ne.s32.totalorder %s6394_s17, %s5520_s27  ;;  %p5528_p10 = scmp.lt.s32.totalorder %s5526_s26, %s5520_s27 }
 0x1c3   : > { %p5522_p6 = pnand %p5521_p13, %p6508_p1  ;;  %p5529_p0 = por %p5528_p10, %p5527_p5 }
 0x1c5   : > { %p5523_p9 = pneg %p5522_p6 }
 0x1c7   : > { %p5530_p2 = pnand %p5529_p0, %p5523_p9 }
 0x22a   : > { %v762_v15 = vpop.permute.xlu1 %761  ;;  %v754_v16 = vpop.permute.xlu0 %753 }
 0x22b   : > { %764 = vst.msk [vmem:[#allocation2 + $0x3] sm:$0x1] %vm750_vm3, %v762_v15  ;;  %756 = vst.msk [vmem:[#allocation2 + $0x1] sm:$0x1] %vm750_vm3, %v754_v16 }
 0x22e   : > { %v758_v17 = vpop.permute.xlu0 %757  ;;  %v768_v18 = vpop.permute.xlu1 %767 }
 0x22f   : > { %760 = vst.msk [vmem:[#allocation2 + $0x2] sm:$0x1] %vm750_vm3, %v758_v17  ;;  %770 = vst.msk [vmem:[#allocation2 + $0x5] sm:$0x1] %vm750_vm3, %v768_v18 }
 0x232   : > { %v772_v19 = vpop.permute.xlu0 %771  ;;  %v776_v20 = vpop.permute.xlu1 %775 }
 0x233   : > { %774 = vst.msk [vmem:[#allocation2 + $0x6] sm:$0x1] %vm750_vm3, %v772_v19  ;;  %778 = vst.msk [vmem:[#allocation2 + $0x7] sm:$0x1] %vm750_vm3, %v776_v20 }
 0x23a   : > { %v779_v22 = vld [vmem:[#allocation2] sm:$0xff] }
 0x23b   : > { %v781_v23 = vadd.f32 %v780_v21, %v779_v22 }
 0x23d   : > { %v785_v24 = vsel %vm784_vm4, %v781_v23, 0.0 }
 0x23e   : > { %786 = vadd.xlane.f32.xlu0 %v785_v24 }
 0x2cb   : > { %v787_v25 = vpop.xlane.xlu0 %786 }
 0x2cc   : > { %v789_v26 = vmul.f32 0.03125, %v787_v25 }
 0x2ce   : > { %v790_v27 = vsub.f32 %v781_v23, %v789_v26 }
 0x2d0   : > { %v791_v28 = vmul.f32 %v790_v27, %v790_v27 }
 0x2d2   : > { %v792_v29 = vsel %vm784_vm4, %v791_v28, 0.0 }
 0x2d3   : > { %793 = vadd.xlane.f32.xlu1 %v792_v29 }
 0x360   : > { %v794_v34 = vpop.xlane.xlu1 %793 }
 0x361   : > { %v795_v35 = vmul.f32 0.03125, %v794_v34 }
 0x363   : > { %v796_v36 = vadd.f32 1e-06, %v795_v35 }
 0x365   : > { %5282 = vrsqrt.f32 %v796_v36 }
 0x36f   : > { %v5283_v37 = vpop.eup %5282 }
 0x370   : > { %v798_v39 = vmul.f32 %v5283_v37, %v790_v27 }
 0x372   : > { %v805_v41 = vmul.f32 %v4451_v38, %v798_v39 }
 0x374   : > { %v5998_v42 = vadd.f32 %v4452_v40, %v805_v41 }
 0x376   : > { %v6002_v45 = vpack.c.bf16 %v5998_v42, %v5998_v42 }
 0x378   : > { %4743 = vmatmul.mubr.msk.bf16.vlgmr.msra.gmra.mrb[4].mxu1 %vm784_vm4, %v6002_v45  ;;  %4751 = vmatmul.mubr.msk.bf16.vlgmr.msra.gmra.mrb[0].mxu0 %vm784_vm4, %v6002_v45 }
 0x379   : > { %4755 = vmatpush3.bf16.msra.mxu1 %v5226_v43  ;;  %4763 = vmatpush3.bf16.msra.mxu0 %v5227_v44 }
 0x37a   : > { %4756 = vmatprep.subr.bf16.mxu1 %v5612_v1  ;;  %4764 = vmatprep.subr.bf16.mxu0 %v5612_v1 }
 0x37b   : > { %4758 = vmatprep.mubr.msk.bf16.mxu1 %vm5617_vm5, %v5612_v1  ;;  %4766 = vmatprep.mubr.msk.bf16.mxu0 %vm5617_vm5, %v5612_v1 }
 0x37d   : > { %4757 = vmatpush3.bf16.msra.mxu1 %v5228_v46  ;;  %4765 = vmatpush3.bf16.msra.mxu0 %v5229_v47 }
 0x37e   : > { %4770 = vmatprep.subr.bf16.mxu1 %v5612_v1  ;;  %4778 = vmatprep.subr.bf16.mxu0 %v5612_v1 }
 0x380   : > { %4759 = vmatmul.mubr.msk.bf16.vlgmr.msra.gmra.mrb[8].mxu1 %vm784_vm4, %v6002_v45  ;;  %4767 = vmatmul.mubr.msk.bf16.vlgmr.msra.gmra.mrb[4].mxu0 %vm784_vm4, %v6002_v45 }
 0x381   : > { %4771 = vmatpush3.bf16.msra.mxu1 %v5230_v48  ;;  %4779 = vmatpush3.bf16.msra.mxu0 %v5231_v49 }
 0x382   : > { %4772 = vmatprep.subr.bf16.mxu1 %v5612_v1  ;;  %4780 = vmatprep.subr.bf16.mxu0 %v5612_v1 }
 0x383   : > { %4774 = vmatprep.mubr.msk.bf16.mxu1 %vm5617_vm5, %v5612_v1  ;;  %4782 = vmatprep.mubr.msk.bf16.mxu0 %vm5617_vm5, %v5612_v1 }
 0x385   : > { %4773 = vmatpush3.bf16.msra.mxu1 %v5232_v50  ;;  %4781 = vmatpush3.bf16.msra.mxu0 %v5233_v51  ;;  %v817_v50 = vlaneseq  ;;  %v813_v51 = vld [vmem:[%s681_s2] sm:$0x1]  ;;  %s6503_s2 = sld [smem:[#allocation33_spill]] }
 0x386   : > { %4786 = vmatprep.subr.bf16.mxu1 %v5612_v1  ;;  %4794 = vmatprep.subr.bf16.mxu0 %v5612_v1  ;;  %vm814_vm7 = vcmp.eq.f32.partialorder %v813_v51, 0.0  ;;  %v873_v51 = vld [vmem:[#allocation11 + $0xc] sm:$0xf] }
 0x388   : > { %4775 = vmatmul.mubr.msk.bf16.vlgmr.msra.gmra.mrb[12].mxu1 %vm784_vm4, %v6002_v45  ;;  %4783 = vmatmul.mubr.msk.bf16.vlgmr.msra.gmra.mrb[8].mxu0 %vm784_vm4, %v6002_v45 }
 0x389   : > { %4787 = vmatpush3.bf16.msra.mxu1 %v5234_v52  ;;  %4795 = vmatpush3.bf16.msra.mxu0 %v5235_v53  ;;  %v818_v52 = vshrl.u32 %v817_v50, 7 }
 0x38a   : > { %4788 = vmatprep.subr.bf16.mxu1 %v5612_v1  ;;  %4796 = vmatprep.subr.bf16.mxu0 %v5612_v1 }
 0x38b   : > { %4790 = vmatprep.mubr.msk.bf16.mxu1 %vm5617_vm5, %v5612_v1  ;;  %4798 = vmatprep.mubr.msk.bf16.mxu0 %vm5617_vm5, %v5612_v1  ;;  %v819_v53 = vsub.s32 0, %v818_v52 }
 0x38d   : > { %4789 = vmatpush3.bf16.msra.mxu1 %v5236_v54  ;;  %4797 = vmatpush3.bf16.msra.mxu0 %v5237_v55  ;;  %v815_v54 = vsel %vm814_vm7, -1e+09, %v5612_v1 }
 0x38e   : > { %4802 = vmatprep.subr.bf16.mxu1 %v5612_v1  ;;  %4810 = vmatprep.subr.bf16.mxu0 %v5612_v1  ;;  %v6103_v55 = vrot.slane %v815_v54, %v819_v53 }
 0x390   : > { %4791 = vmatmul.mubr.msk.bf16.vlgmr.msra.gmra.mrb[16].mxu1 %vm784_vm4, %v6002_v45  ;;  %4799 = vmatmul.mubr.msk.bf16.vlgmr.msra.gmra.mrb[12].mxu0 %vm784_vm4, %v6002_v45 }
 0x391   : > { %4803 = vmatpush3.bf16.msra.mxu1 %v5238_v56  ;;  %4811 = vmatpush3.bf16.msra.mxu0 %v5239_v57 }
 0x392   : > { %4804 = vmatprep.subr.bf16.mxu1 %v5612_v1  ;;  %4812 = vmatprep.subr.bf16.mxu0 %v5612_v1 }
 0x393   : > { %4806 = vmatprep.mubr.msk.bf16.mxu1 %vm5617_vm5, %v5612_v1  ;;  %4814 = vmatprep.mubr.msk.bf16.mxu0 %vm5617_vm5, %v5612_v1 }
 0x395   : > { %4805 = vmatpush3.bf16.msra.mxu1 %v5240_v58  ;;  %4813 = vmatpush3.bf16.msra.mxu0 %v5241_v59 }
 0x396   : > { %4818 = vmatprep.subr.bf16.mxu1 %v5612_v1  ;;  %4826 = vmatprep.subr.bf16.mxu0 %v5612_v1 }
 0x398   : > { %4807 = vmatmul.mubr.msk.bf16.vlgmr.msra.gmra.mrb[20].mxu1 %vm784_vm4, %v6002_v45  ;;  %4815 = vmatmul.mubr.msk.bf16.vlgmr.msra.gmra.mrb[16].mxu0 %vm784_vm4, %v6002_v45 }
 0x399   : > { %4819 = vmatpush3.bf16.msra.mxu1 %v5242_v60  ;;  %4827 = vmatpush3.bf16.msra.mxu0 %v5243_v61 }
 0x39a   : > { %4820 = vmatprep.subr.bf16.mxu1 %v5612_v1  ;;  %4828 = vmatprep.subr.bf16.mxu0 %v5612_v1 }
 0x39b   : > { %4822 = vmatprep.mubr.msk.bf16.mxu1 %vm5617_vm5, %v5612_v1  ;;  %4830 = vmatprep.mubr.msk.bf16.mxu0 %vm5617_vm5, %v5612_v1 }
 0x39d   : > { %4821 = vmatpush3.bf16.msra.mxu1 %v5244_v62  ;;  %4829 = vmatpush3.bf16.msra.mxu0 %v5245_v63 }
 0x39e   : > { %4834 = vmatprep.subr.mxu1 %v5612_v1  ;;  %4839 = vmatprep.subr.mxu0 %v5612_v1 }
 0x3a0   : > { %4823 = vmatmul.mubr.msk.bf16.vlgmr.msra.gmra.mrb[24].mxu1 %vm784_vm4, %v6002_v45  ;;  %4831 = vmatmul.mubr.msk.bf16.vlgmr.msra.gmra.mrb[20].mxu0 %vm784_vm4, %v6002_v45 }
 0x3a1   : > { %4836 = vmatprep.mubr.msk.f32.mxu1 %vm5617_vm5, %v5612_v1  ;;  %4841 = vmatprep.mubr.msk.f32.mxu0 %vm5617_vm5, %v5612_v1 }
 0x44b   : > { %v942_v0 = vpop.f32.mrb[4].mxu1  ;;  %v994_v2 = vpop.f32.mrb[0].mxu0 }
 0x44c   : > { %v4744_v3 = vpop.f32.mrb[5].mxu1  ;;  %v4752_v4 = vpop.f32.mrb[1].mxu0 }
 0x44d   : > { %v945_v5 = vpop.f32.mrb[6].mxu1  ;;  %v997_v6 = vpop.f32.mrb[2].mxu0 }
 0x44e   : > { %v4745_v7 = vpop.f32.mrb[7].mxu1  ;;  %v4753_v8 = vpop.f32.mrb[3].mxu0 }
 0x453   : > { %v1046_v9 = vpop.f32.mrb[8].mxu1  ;;  %v1098_v10 = vpop.f32.mrb[4].mxu0 }
 0x454   : > { %v4760_v11 = vpop.f32.mrb[9].mxu1  ;;  %v4768_v12 = vpop.f32.mrb[5].mxu0 }
 0x455   : > { %v1049_v13 = vpop.f32.mrb[10].mxu1  ;;  %v1101_v14 = vpop.f32.mrb[6].mxu0 }
 0x456   : > { %v4761_v15 = vpop.f32.mrb[11].mxu1  ;;  %v4769_v16 = vpop.f32.mrb[7].mxu0 }
 0x45b   : > { %v1150_v17 = vpop.f32.mrb[12].mxu1  ;;  %v1202_v18 = vpop.f32.mrb[8].mxu0 }
 0x45c   : > { %v4776_v19 = vpop.f32.mrb[13].mxu1  ;;  %v4784_v20 = vpop.f32.mrb[9].mxu0  ;;  %4835 = vmatpush3.xpose.msk.msra.mxu1 %vm1520_vm6, %v1150_v17  ;;  %4840 = vmatpush3.xpose.msk.msra.mxu0 %vm1520_vm6, %v1202_v18 }
 0x45d   : > { %v1153_v21 = vpop.f32.mrb[14].mxu1  ;;  %v1205_v22 = vpop.f32.mrb[10].mxu0  ;;  %4844 = vmatprep.subr.mxu1 %v5612_v1  ;;  %4849 = vmatprep.subr.mxu0 %v5612_v1 }
 0x45e   : > { %v4777_v23 = vpop.f32.mrb[15].mxu1  ;;  %v4785_v24 = vpop.f32.mrb[11].mxu0 }
 0x45f   : > { %4837 = vmatmul.mubr.msk.f32.vlgmr.msra.gmra.mrb[28].mxu1 %vm1520_vm6, %v942_v0  ;;  %4842 = vmatmul.mubr.msk.f32.vlgmr.msra.gmra.mrb[24].mxu0 %vm1520_vm6, %v994_v2 }
 0x460   : > { %4846 = vmatprep.mubr.msk.f32.mxu1 %vm5617_vm5, %v5612_v1  ;;  %4851 = vmatprep.mubr.msk.f32.mxu0 %vm5617_vm5, %v5612_v1 }
 0x463   : > { %v1254_v25 = vpop.f32.mrb[16].mxu1  ;;  %v1306_v26 = vpop.f32.mrb[12].mxu0 }
 0x464   : > { %v4792_v27 = vpop.f32.mrb[17].mxu1  ;;  %v4800_v28 = vpop.f32.mrb[13].mxu0  ;;  %4845 = vmatpush3.xpose.msk.msra.mxu1 %vm1520_vm6, %v1254_v25  ;;  %4850 = vmatpush3.xpose.msk.msra.mxu0 %vm1520_vm6, %v1306_v26 }
 0x465   : > { %v1257_v29 = vpop.f32.mrb[18].mxu1  ;;  %v1309_v30 = vpop.f32.mrb[14].mxu0  ;;  %4854 = vmatprep.subr.mxu1 %v5612_v1  ;;  %4859 = vmatprep.subr.mxu0 %v5612_v1 }
 0x466   : > { %v4793_v31 = vpop.f32.mrb[19].mxu1  ;;  %v4801_v32 = vpop.f32.mrb[15].mxu0 }
 0x467   : > { %4847 = vmatmul.mubr.msk.f32.vlgmr.msra.gmra.mrb[30].mxu1 %vm1520_vm6, %v1046_v9  ;;  %4852 = vmatmul.mubr.msk.f32.vlgmr.msra.gmra.mrb[26].mxu0 %vm1520_vm6, %v1098_v10 }
 0x468   : > { %4856 = vmatprep.mubr.msk.f32.mxu1 %vm5617_vm5, %v5612_v1  ;;  %4861 = vmatprep.mubr.msk.f32.mxu0 %vm5617_vm5, %v5612_v1 }
 0x46b   : > { %v1358_v33 = vpop.f32.mrb[20].mxu1  ;;  %v1410_v34 = vpop.f32.mrb[16].mxu0 }
 0x46c   : > { %v4808_v35 = vpop.f32.mrb[21].mxu1  ;;  %v4816_v36 = vpop.f32.mrb[17].mxu0  ;;  %4855 = vmatpush3.msra.mxu1 %v1358_v33  ;;  %4860 = vmatpush3.msra.mxu0 %v1410_v34 }
 0x46d   : > { %v1361_v37 = vpop.f32.mrb[22].mxu1  ;;  %v1413_v38 = vpop.f32.mrb[18].mxu0  ;;  %4864 = vmatprep.subr.mxu1 %v5612_v1  ;;  %4869 = vmatprep.subr.mxu0 %v5612_v1 }
 0x46e   : > { %v4809_v39 = vpop.f32.mrb[23].mxu1  ;;  %v4817_v40 = vpop.f32.mrb[19].mxu0 }
 0x473   : > { %v6094_v41 = vpop.f32.mrb[24].mxu1  ;;  %v6096_v43 = vpop.f32.mrb[20].mxu0 }
 0x474   : > { %v4824_v44 = vpop.f32.mrb[25].mxu1  ;;  %v4832_v45 = vpop.f32.mrb[21].mxu0 }
 0x475   : > { %v1465_v46 = vpop.f32.mrb[26].mxu1  ;;  %v1517_v47 = vpop.f32.mrb[22].mxu0  ;;  %v871_v44 = vld [vmem:[#allocation11 + $0x4] sm:$0xf] }
 0x476   : > { %v4825_v48 = vpop.f32.mrb[27].mxu1  ;;  %v4833_v49 = vpop.f32.mrb[23].mxu0  ;;  %v2215_v45 = vsel %vm699_vm0, %v871_v44, 0  ;;  %v872_v46 = vld [vmem:[#allocation11 + $0x8] sm:$0xf] }
 0x477   : > { %v2261_v50 = vsel %vm699_vm0, %v872_v46, 0 }
 0x532   : > { %v1593_v56 = vpop.f32.mrb[28].mxu1  ;;  %v1669_v57 = vpop.f32.mrb[24].mxu0 }
 0x533   : > { %v1594_v58 = vadd.f32 %v1593_v56, %v6103_v55  ;;  %v4838_v59 = vpop.f32.mrb[29].mxu1  ;;  %v4843_v60 = vpop.f32.mrb[25].mxu0  ;;  %v1670_v61 = vadd.f32 %v1669_v57, %v6103_v55  ;;  %v2307_v56 = vsel %vm699_vm0, %v873_v51, 0 }
 0x535   : > { %v1825_v62 = vsel %vm1520_vm6, %v1594_v58, -inf  ;;  %v1828_v63 = vsel %vm1520_vm6, %v1670_v61, -inf }
 0x536   : > { %1826 = vmax.xlane.f32.xlu0 %v1825_v62 }
 0x53a   : > { %v1821_v0 = vpop.f32.mrb[26].mxu0  ;;  %1829 = vmax.xlane.f32.xlu0 %v1828_v63  ;;  %v1745_v2 = vpop.f32.mrb[30].mxu1 }
 0x53b   : > { %v1822_v3 = vadd.f32 %v1821_v0, %v6103_v55  ;;  %v1746_v4 = vadd.f32 %v1745_v2, %v6103_v55  ;;  %v4848_v5 = vpop.f32.mrb[31].mxu1  ;;  %v4853_v6 = vpop.f32.mrb[27].mxu0 }
 0x53d   : > { %v1834_v7 = vsel %vm1520_vm6, %v1822_v3, -inf  ;;  %v1831_v8 = vsel %vm1520_vm6, %v1746_v4, -inf }
 0x53e   : > { %1835 = vmax.xlane.f32.xlu0 %v1834_v7  ;;  %1832 = vmax.xlane.f32.xlu1 %v1831_v8 }
 0x5c3   : > { %v1827_v9 = vpop.xlane.xlu0 %1826 }
 0x5c4   : > { %v1837_v10 = vsub.f32 %v1594_v58, %v1827_v9 }
 0x5c6   : > { %v1841_v11 = vmul.f32 1.442695, %v1837_v10 }
 0x5c7   : > { %v1830_v12 = vpop.xlane.xlu0 %1829 }
 0x5c8   : > { %5284 = vpow2.f32 %v1841_v11  ;;  %v1838_v13 = vsub.f32 %v1670_v61, %v1830_v12 }
 0x5ca   : > { %v1843_v14 = vmul.f32 1.442695, %v1838_v13 }
 0x5cb   : > { %v1836_v15 = vpop.xlane.xlu0 %1835  ;;  %v1833_v16 = vpop.xlane.xlu1 %1832 }
 0x5cc   : > { %5286 = vpow2.f32 %v1843_v14  ;;  %v1840_v17 = vsub.f32 %v1822_v3, %v1836_v15  ;;  %v1839_v18 = vsub.f32 %v1746_v4, %v1833_v16 }
 0x5ce   : > { %v1847_v19 = vmul.f32 1.442695, %v1840_v17  ;;  %v1845_v20 = vmul.f32 1.442695, %v1839_v18 }
 0x5d0   : > { %5288 = vpow2.f32 %v1847_v19 }
 0x5d1   : > { %5290 = vpow2.f32 %v1845_v20 }
 0x5d2   : > { %v5285_v21 = vpop.eup %5284 }
 0x5d3   : > { %v1849_v22 = vsel %vm1520_vm6, %v5285_v21, 0.0 }
 0x5d4   : > { %1850 = vadd.xlane.f32.xlu1 %v1849_v22 }
 0x5d6   : > { %v5287_v23 = vpop.eup %5286 }
 0x5d7   : > { %v1852_v24 = vsel %vm1520_vm6, %v5287_v23, 0.0 }
 0x5d8   : > { %1853 = vadd.xlane.f32.xlu0 %v1852_v24 }
 0x5da   : > { %v5289_v25 = vpop.eup %5288 }
 0x5db   : > { %v5291_v26 = vpop.eup %5290  ;;  %v1858_v27 = vsel %vm1520_vm6, %v5289_v25, 0.0 }
 0x5dc   : > { %1859 = vadd.xlane.f32.xlu0 %v1858_v27  ;;  %v1855_v28 = vsel %vm1520_vm6, %v5291_v26, 0.0  ;;  %v5247_v27 = vld [vmem:[#allocation12 + $0x8] sm:$0xff]  }
 0x5dd   : > { %1856 = vadd.xlane.f32.xlu1 %v1855_v28  ;;  %v5249_v28 = vld [vmem:[%s6449_s14 + $0x8] sm:$0xff]  }
 0x661   : > { %v1851_v29 = vpop.xlane.xlu1 %1850 }
 0x662   : > { %5292 = vrcp.f32 %v1851_v29 }
 0x665   : > { %v1854_v30 = vpop.xlane.xlu0 %1853 }
 0x666   : > { %5294 = vrcp.f32 %v1854_v30 }
 0x669   : > { %v1860_v31 = vpop.xlane.xlu0 %1859 }
 0x66a   : > { %5296 = vrcp.f32 %v1860_v31  ;;  %v1857_v32 = vpop.xlane.xlu1 %1856 }
 0x66b   : > { %5298 = vrcp.f32 %v1857_v32 }
 0x66c   : > { %v5293_v33 = vpop.eup %5292 }
 0x66d   : > { %v1865_v34 = vmul.f32 %v5293_v33, %v5285_v21  ;;  %v4505_v33 = vld [vmem:[%s6445_s10] ss:$0 sm:$0xff] }
 0x66f   : > { %4857 = vmatmul.mubr.msk.f32.vlgmr.msra.gmra.mrb[32].mxu1 %vm1520_vm6, %v1865_v34 }
 0x670   : > { %v5295_v35 = vpop.eup %5294  ;;  %4865 = vmatpush3.msra.mxu1 %v6094_v41  ;;  %4866 = vmatprep.mubr.msk.f32.mxu1 %vm5617_vm5, %v5612_v1  ;;  %v870_v41 = vld [vmem:[#allocation11] sm:$0xf] }
 0x671   : > { %v1866_v36 = vmul.f32 %v5295_v35, %v5287_v23  ;;  %4874 = vmatprep.subr.bf16.mxu1 %v5612_v1  ;;  %v4506_v35 = vld [vmem:[%s6446_s11] ss:$0 sm:$0xff] }
 0x673   : > { %4862 = vmatmul.mubr.msk.f32.vlgmr.msra.gmra.mrb[28].mxu0 %vm1520_vm6, %v1866_v36 }
 0x674   : > { %v5297_v37 = vpop.eup %5296  ;;  %4870 = vmatpush3.msra.mxu0 %v6096_v43  ;;  %4871 = vmatprep.mubr.msk.f32.mxu0 %vm5617_vm5, %v5612_v1  ;;  %v2169_v43 = vsel %vm699_vm0, %v870_v41, 0  ;;  %v4507_v41 = vld [vmem:[#allocation14] ss:$0 sm:$0xff] }
 0x675   : > { %v5299_v38 = vpop.eup %5298  ;;  %v1868_v39 = vmul.f32 %v5297_v37, %v5289_v25  ;;  %4880 = vmatprep.subr.bf16.mxu0 %v5612_v1 }
 0x676   : > { %v1867_v40 = vmul.f32 %v5299_v38, %v5291_v26  ;;  %v5246_v26 = vld [vmem:[#allocation12] sm:$0xff]  }
 0x677   : > { %4872 = vmatmul.mubr.msk.f32.vlgmr.msra.gmra.mrb[30].mxu0 %vm1520_vm6, %v1868_v39  ;;  %v5250_v39 = vld [vmem:[%s6449_s14 + $0x10] sm:$0xff]  }
 0x678   : > { %4867 = vmatmul.mubr.msk.f32.vlgmr.msra.gmra.mrb[34].mxu1 %vm1520_vm6, %v1867_v40  ;;  %4882 = vmatprep.mubr.msk.bf16.mxu0 %vm5617_vm5, %v5612_v1  ;;  %v5251_v40 = vld [vmem:[%s6449_s14 + $0x18] sm:$0xff]  }
 0x679   : > { %4876 = vmatprep.mubr.msk.bf16.mxu1 %vm5617_vm5, %v5612_v1  ;;  %4875 = vmatpush3.bf16.msra.mxu1 %v2169_v43 }
 0x67a   : > { %4886 = vmatprep.subr.bf16.mxu1 %v5612_v1  ;;  %4881 = vmatpush3.bf16.msra.mxu0 %v2215_v45 }
 0x67b   : > { %4892 = vmatprep.subr.bf16.mxu0 %v5612_v1 }
 0x742   : > { %v1938_v47 = vpop.f32.mrb[32].mxu1 }
 0x743   : > { %v2161_v48 = vpack.c.bf16 %v1938_v47, %v1938_v47  ;;  %v4858_v49 = vpop.f32.mrb[33].mxu1 }
 0x745   : > { %4877 = vmatmul.mubr.msk.bf16.vlgmr.msra.gmra.mrb[36].mxu1 %vm1520_vm6, %v2161_v48 }
 0x746   : > { %v2011_v52 = vpop.f32.mrb[28].mxu0  ;;  %4887 = vmatpush3.bf16.msra.mxu1 %v2261_v50  ;;  %4888 = vmatprep.mubr.msk.bf16.mxu1 %vm5617_vm5, %v5612_v1  ;;  %v4511_v50 = vld [vmem:[%s6450_s15] ss:$0 sm:$0xff] }
 0x747   : > { %v2162_v53 = vpack.c.bf16 %v2011_v52, %v2011_v52  ;;  %v4863_v54 = vpop.f32.mrb[29].mxu0  ;;  %4898 = vmatprep.subr.bf16.mxu1 %v5612_v1 }
 0x749   : > { %4883 = vmatmul.mubr.msk.bf16.vlgmr.msra.gmra.mrb[32].mxu0 %vm1520_vm6, %v2162_v53 }
 0x74a   : > { %v2157_v57 = vpop.f32.mrb[30].mxu0  ;;  %4893 = vmatpush3.bf16.msra.mxu0 %v2307_v56  ;;  %4894 = vmatprep.mubr.msk.bf16.mxu0 %vm5617_vm5, %v5612_v1 }
 0x74b   : > { %v2084_v58 = vpop.f32.mrb[34].mxu1  ;;  %v4873_v59 = vpop.f32.mrb[31].mxu0  ;;  %4906 = vmatprep.subr.bf16.mxu0 %v5612_v1  ;;  %v2164_v62 = vpack.c.bf16 %v2157_v57, %v2157_v57 }
 0x74c   : > { %v2163_v60 = vpack.c.bf16 %v2084_v58, %v2084_v58  ;;  %v4868_v61 = vpop.f32.mrb[35].mxu1 }
 0x74e   : > { %4889 = vmatmul.mubr.msk.bf16.vlgmr.msra.gmra.mrb[40].mxu1 %vm1520_vm6, %v2163_v60 }
 0x74f   : > { %4902 = vmatprep.mubr.msk.bf16.mxu1 %vm5617_vm5, %v5612_v1  ;;  %4899 = vmatpush3.bf16.msra.mxu1 %v5246_v26  ;;  %v5267_v26 = vld [vmem:[#allocation9 + $0x48] sm:$0xff]  }
 0x750   : > { %4900 = vmatprep.subr.bf16.mxu1 %v5612_v1 }
 0x751   : > { %4895 = vmatmul.mubr.msk.bf16.vlgmr.msra.gmra.mrb[36].mxu0 %vm1520_vm6, %v2164_v62 }
 0x752   : > { %4914 = vmatprep.mubr.msk.bf16.mxu0 %vm5617_vm5, %v5612_v1 }
 0x753   : > { %4901 = vmatpush3.bf16.msra.mxu1 %v5247_v27  ;;  %v5268_v27 = vld [vmem:[#allocation8 + $0x70] sm:$0xff]  }
 0x754   : > { %4918 = vmatprep.subr.bf16.mxu1 %v5612_v1 }
 0x818   : > { %v2205_v63 = vpop.f32.mrb[36].mxu1 }
 0x819   : > { %v4878_v0 = vpop.f32.mrb[37].mxu1 }
 0x81a   : > { %v2208_v2 = vpop.f32.mrb[38].mxu1  ;;  %v5252_v0 = vld [vmem:[#allocation6 + $0x40] sm:$0xff]  }
 0x81b   : > { %v4879_v3 = vpop.f32.mrb[39].mxu1  ;;  %v5253_v2 = vld [vmem:[#allocation6 + $0x60] sm:$0xff]  }
 0x81c   : > { %v2251_v4 = vpop.f32.mrb[32].mxu0  ;;  %v5254_v3 = vld [vmem:[#allocation6 + $0x48] sm:$0xff]  }
 0x81d   : > { %v2349_v5 = vadd.f32 %v2251_v4, %v2205_v63  ;;  %v4884_v6 = vpop.f32.mrb[33].mxu0  ;;  %v5255_v4 = vld [vmem:[#allocation6 + $0x68] sm:$0xff]  }
 0x81e   : > { %v2254_v7 = vpop.f32.mrb[34].mxu0 }
 0x81f   : > { %v4885_v8 = vpop.f32.mrb[35].mxu0 }
 0x821   : > { %v2297_v9 = vpop.f32.mrb[40].mxu1 }
 0x822   : > { %v2350_v10 = vadd.f32 %v2349_v5, %v2297_v9  ;;  %v4890_v11 = vpop.f32.mrb[41].mxu1  ;;  %v4517_v9 = vld [vmem:[%s6503_s2] ss:$0 sm:$0xff] }
 0x823   : > { %v2300_v12 = vpop.f32.mrb[42].mxu1  ;;  %v4518_v11 = vld [vmem:[%s6504_s16] ss:$0 sm:$0xff] }
 0x824   : > { %v4891_v13 = vpop.f32.mrb[43].mxu1  ;;  %v2343_v14 = vpop.f32.mrb[36].mxu0 }
 0x825   : > { %v2351_v15 = vadd.f32 %v2350_v10, %v2343_v14  ;;  %v4896_v16 = vpop.f32.mrb[37].mxu0  ;;  %v5256_v14 = vld [vmem:[#allocation6 + $0x50] sm:$0xff]  }
 0x826   : > { %v2346_v17 = vpop.f32.mrb[38].mxu0 }
 0x827   : > { %v4897_v18 = vpop.f32.mrb[39].mxu0  ;;  %v2352_v19 = vadd.f32 %v2351_v15, %v5998_v42  ;;  %v5248_v42 = vld [vmem:[%s6449_s14] sm:$0xff]   ;;  %v5257_v15 = vld [vmem:[#allocation8 + $0x40] sm:$0xff]   ;;  %v5258_v17 = vld [vmem:[#allocation6 + $0x58] sm:$0xff]  }
 0x828   : > { %4907 = vmatpush3.bf16.msra.mxu0 %v5248_v42  ;;  %v5259_v18 = vld [vmem:[#allocation8 + $0x48] sm:$0xff]   ;;  %v5269_v42 = vld [vmem:[#allocation9 + $0x60] sm:$0xff]  }
 0x829   : > { %v2353_v20 = vsel %vm784_vm4, %v2352_v19, 0.0  ;;  %4908 = vmatprep.subr.bf16.mxu0 %v5612_v1 }
 0x82a   : > { %2354 = vadd.xlane.f32.xlu1 %v2353_v20  ;;  %v5261_v20 = vld [vmem:[#allocation8 + $0x60] sm:$0xff]  }
 0x82c   : > { %4909 = vmatpush3.bf16.msra.mxu0 %v5249_v28  ;;  %v5270_v28 = vld [vmem:[#allocation8 + $0x78] sm:$0xff]  }
 0x82d   : > { %4910 = vmatprep.subr.bf16.mxu0 %v5612_v1 }
 0x830   : > { %4911 = vmatpush3.bf16.msra.mxu0 %v5250_v39 }
 0x831   : > { %4912 = vmatprep.subr.bf16.mxu0 %v5612_v1 }
 0x834   : > { %4913 = vmatpush3.bf16.msra.mxu0 %v5251_v40 }
 0x835   : > { %4934 = vmatprep.subr.bf16.mxu0 %v5612_v1 }
 0x8b7   : > { %v2355_v21 = vpop.xlane.xlu1 %2354 }
 0x8b8   : > { %v2356_v22 = vmul.f32 0.03125, %v2355_v21  ;;  %v5262_v21 = vld [vmem:[#allocation6 + $0x78] sm:$0xff]  }
 0x8ba   : > { %v2357_v23 = vsub.f32 %v2352_v19, %v2356_v22  ;;  %v5260_v19 = vld [vmem:[#allocation6 + $0x70] sm:$0xff]   ;;  %v5263_v22 = vld [vmem:[#allocation8 + $0x68] sm:$0xff]  }
 0x8bc   : > { %v2358_v24 = vmul.f32 %v2357_v23, %v2357_v23 }
 0x8be   : > { %v2359_v25 = vsel %vm784_vm4, %v2358_v24, 0.0  ;;  %v5265_v24 = vld [vmem:[#allocation9 + $0x40] sm:$0xff]  }
 0x8bf   : > { %2360 = vadd.xlane.f32.xlu0 %v2359_v25  ;;  %v5266_v25 = vld [vmem:[#allocation8 + $0x58] sm:$0xff]  }
 0x94c   : > { %v2361_v29 = vpop.xlane.xlu0 %2360 }
 0x94d   : > { %v2362_v30 = vmul.f32 0.03125, %v2361_v29  ;;  %v5271_v29 = vld [vmem:[#allocation9 + $0x68] sm:$0xff]  }
 0x94f   : > { %v2363_v31 = vadd.f32 1e-06, %v2362_v30  ;;  %v5272_v30 = vld [vmem:[#allocation9 + $0x50] sm:$0xff]  }
 0x951   : > { %5300 = vrsqrt.f32 %v2363_v31  ;;  %v5273_v31 = vld [vmem:[#allocation9 + $0x58] sm:$0xff]  }
 0x95b   : > { %v5301_v32 = vpop.eup %5300 }
 0x95c   : > { %v2365_v34 = vmul.f32 %v5301_v32, %v2357_v23  ;;  %v5264_v23 = vld [vmem:[#allocation8 + $0x50] sm:$0xff]  }
 0x95d   : > { %v5274_v32 = vld [vmem:[#allocation9 + $0x70] sm:$0xff]  }
 0x95e   : > { %v2372_v36 = vmul.f32 %v4505_v33, %v2365_v34  ;;  %v5275_v33 = vld [vmem:[#allocation9 + $0x78] sm:$0xff]  }
 0x960   : > { %v2379_v37 = vadd.f32 %v4506_v35, %v2372_v36 }
 0x962   : > { %v2380_v38 = vpack.c.bf16 %v2379_v37, %v2379_v37 }
 0x964   : > { %4903 = vmatmul.mubr.msk.bf16.vlgmr.msra.gmra.mrb[44].mxu1 %vm784_vm4, %v2380_v38 }
 0x965   : > { %4922 = vmatprep.mubr.msk.bf16.mxu1 %vm5617_vm5, %v5612_v1  ;;  %4919 = vmatpush3.bf16.msra.mxu1 %v5252_v0 }
 0x966   : > { %4920 = vmatprep.subr.bf16.mxu1 %v5612_v1 }
 0x969   : > { %4921 = vmatpush3.bf16.msra.mxu1 %v5254_v3 }
 0x96a   : > { %4926 = vmatprep.subr.bf16.mxu1 %v5612_v1 }
 0xa37   : > { %v2436_v43 = vpop.f32.mrb[44].mxu1 }
 0xa38   : > { %v2437_v44 = vadd.f32 %v4507_v41, %v2436_v43  ;;  %v4904_v45 = vpop.f32.mrb[45].mxu1 }
 0xa39   : > { %v2439_v46 = vpop.f32.mrb[46].mxu1 }
 0xa3a   : > { %v2442_v47 = vmax.f32 %v2437_v44, 0.0  ;;  %v4905_v48 = vpop.f32.mrb[47].mxu1 }
 0xa3c   : > { %v2443_v49 = vpack.c.bf16 %v2442_v47, %v2442_v47 }
 0xa3e   : > { %4915 = vmatmul.mubr.msk.bf16.vlgmr.msra.gmra.mrb[40].mxu0 %vm2474_vm8, %v2443_v49 }
 0xa3f   : > { %4938 = vmatprep.mubr.msk.bf16.mxu0 %vm5617_vm5, %v5612_v1  ;;  %4935 = vmatpush3.bf16.msra.mxu0 %v5253_v2 }
 0xa40   : > { %4936 = vmatprep.subr.bf16.mxu0 %v5612_v1 }
 0xa43   : > { %4937 = vmatpush3.bf16.msra.mxu0 %v5255_v4 }
 0xa44   : > { %4950 = vmatprep.subr.bf16.mxu0 %v5612_v1 }
 0xb11   : > { %v2512_v51 = vpop.f32.mrb[40].mxu0 }
 0xb12   : > { %v2513_v52 = vadd.f32 %v4511_v50, %v2512_v51  ;;  %v4916_v53 = vpop.f32.mrb[41].mxu0 }
 0xb13   : > { %v2515_v54 = vpop.f32.mrb[42].mxu0 }
 0xb14   : > { %v4917_v56 = vpop.f32.mrb[43].mxu0  ;;  %v2518_v57 = vadd.f32 %v2513_v52, %v2379_v37 }
 0xb16   : > { %v2519_v58 = vsel %vm784_vm4, %v2518_v57, 0.0 }
 0xb17   : > { %2520 = vadd.xlane.f32.xlu1 %v2519_v58 }
 0xba4   : > { %v2521_v59 = vpop.xlane.xlu1 %2520 }
 0xba5   : > { %v2522_v60 = vmul.f32 0.03125, %v2521_v59 }
 0xba7   : > { %v2523_v61 = vsub.f32 %v2518_v57, %v2522_v60 }
 0xba9   : > { %v2524_v62 = vmul.f32 %v2523_v61, %v2523_v61 }
 0xbab   : > { %v2525_v63 = vsel %vm784_vm4, %v2524_v62, 0.0 }
 0xbac   : > { %2526 = vadd.xlane.f32.xlu0 %v2525_v63 }
 0xc39   : > { %v2527_v5 = vpop.xlane.xlu0 %2526 }
 0xc3a   : > { %v2528_v6 = vmul.f32 0.03125, %v2527_v5 }
 0xc3c   : > { %v2529_v7 = vadd.f32 1e-06, %v2528_v6 }
 0xc3e   : > { %5302 = vrsqrt.f32 %v2529_v7 }
 0xc48   : > { %v5303_v8 = vpop.eup %5302 }
 0xc49   : > { %v2531_v10 = vmul.f32 %v5303_v8, %v2523_v61 }
 0xc4b   : > { %v2538_v12 = vmul.f32 %v4517_v9, %v2531_v10 }
 0xc4d   : > { %v6201_v13 = vadd.f32 %v4518_v11, %v2538_v12 }
 0xc4f   : > { %v6205_v16 = vpack.c.bf16 %v6201_v13, %v6201_v13 }
 0xc51   : > { %4923 = vmatmul.mubr.msk.bf16.vlgmr.msra.gmra.mrb[48].mxu1 %vm784_vm4, %v6205_v16  ;;  %4939 = vmatmul.mubr.msk.bf16.vlgmr.msra.gmra.mrb[44].mxu0 %vm784_vm4, %v6205_v16 }
 0xc52   : > { %4927 = vmatpush3.bf16.msra.mxu1 %v5256_v14  ;;  %4951 = vmatpush3.bf16.msra.mxu0 %v5257_v15 }
 0xc53   : > { %4928 = vmatprep.subr.bf16.mxu1 %v5612_v1  ;;  %4952 = vmatprep.subr.bf16.mxu0 %v5612_v1 }
 0xc54   : > { %4930 = vmatprep.mubr.msk.bf16.mxu1 %vm5617_vm5, %v5612_v1  ;;  %4954 = vmatprep.mubr.msk.bf16.mxu0 %vm5617_vm5, %v5612_v1 }
 0xc56   : > { %4929 = vmatpush3.bf16.msra.mxu1 %v5258_v17  ;;  %4953 = vmatpush3.bf16.msra.mxu0 %v5259_v18 }
 0xc57   : > { %4942 = vmatprep.subr.bf16.mxu1 %v5612_v1  ;;  %4966 = vmatprep.subr.bf16.mxu0 %v5612_v1 }
 0xc59   : > { %4931 = vmatmul.mubr.msk.bf16.vlgmr.msra.gmra.mrb[52].mxu1 %vm784_vm4, %v6205_v16  ;;  %4955 = vmatmul.mubr.msk.bf16.vlgmr.msra.gmra.mrb[48].mxu0 %vm784_vm4, %v6205_v16 }
 0xc5a   : > { %4943 = vmatpush3.bf16.msra.mxu1 %v5260_v19  ;;  %4967 = vmatpush3.bf16.msra.mxu0 %v5261_v20 }
 0xc5b   : > { %4944 = vmatprep.subr.bf16.mxu1 %v5612_v1  ;;  %4968 = vmatprep.subr.bf16.mxu0 %v5612_v1 }
 0xc5c   : > { %4946 = vmatprep.mubr.msk.bf16.mxu1 %vm5617_vm5, %v5612_v1  ;;  %4970 = vmatprep.mubr.msk.bf16.mxu0 %vm5617_vm5, %v5612_v1 }
 0xc5e   : > { %4945 = vmatpush3.bf16.msra.mxu1 %v5262_v21  ;;  %4969 = vmatpush3.bf16.msra.mxu0 %v5263_v22 }
 0xc5f   : > { %4958 = vmatprep.subr.bf16.mxu1 %v5612_v1  ;;  %4982 = vmatprep.subr.bf16.mxu0 %v5612_v1 }
 0xc61   : > { %4947 = vmatmul.mubr.msk.bf16.vlgmr.msra.gmra.mrb[56].mxu1 %vm784_vm4, %v6205_v16  ;;  %4971 = vmatmul.mubr.msk.bf16.vlgmr.msra.gmra.mrb[52].mxu0 %vm784_vm4, %v6205_v16 }
 0xc62   : > { %4959 = vmatpush3.bf16.msra.mxu1 %v5264_v23  ;;  %4983 = vmatpush3.bf16.msra.mxu0 %v5265_v24 }
 0xc63   : > { %4960 = vmatprep.subr.bf16.mxu1 %v5612_v1  ;;  %4984 = vmatprep.subr.bf16.mxu0 %v5612_v1 }
 0xc64   : > { %4962 = vmatprep.mubr.msk.bf16.mxu1 %vm5617_vm5, %v5612_v1  ;;  %4986 = vmatprep.mubr.msk.bf16.mxu0 %vm5617_vm5, %v5612_v1 }
 0xc66   : > { %4961 = vmatpush3.bf16.msra.mxu1 %v5266_v25  ;;  %4985 = vmatpush3.bf16.msra.mxu0 %v5267_v26 }
 0xc67   : > { %4974 = vmatprep.subr.bf16.mxu1 %v5612_v1  ;;  %4998 = vmatprep.subr.bf16.mxu0 %v5612_v1 }
 0xc69   : > { %4963 = vmatmul.mubr.msk.bf16.vlgmr.msra.gmra.mrb[60].mxu1 %vm784_vm4, %v6205_v16  ;;  %4987 = vmatmul.mubr.msk.bf16.vlgmr.msra.gmra.mrb[56].mxu0 %vm784_vm4, %v6205_v16 }
 0xc6a   : > { %4975 = vmatpush3.bf16.msra.mxu1 %v5268_v27  ;;  %4999 = vmatpush3.bf16.msra.mxu0 %v5269_v42 }
 0xc6b   : > { %4976 = vmatprep.subr.bf16.mxu1 %v5612_v1  ;;  %5000 = vmatprep.subr.bf16.mxu0 %v5612_v1 }
 0xc6c   : > { %4978 = vmatprep.mubr.msk.bf16.mxu1 %vm5617_vm5, %v5612_v1  ;;  %5002 = vmatprep.mubr.msk.bf16.mxu0 %vm5617_vm5, %v5612_v1 }
 0xc6e   : > { %4977 = vmatpush3.bf16.msra.mxu1 %v5270_v28  ;;  %5001 = vmatpush3.bf16.msra.mxu0 %v5271_v29 }
 0xc6f   : > { %4990 = vmatprep.subr.bf16.mxu1 %v5612_v1  ;;  %5014 = vmatprep.subr.mxu0 %v5612_v1 }
 0xc71   : > { %4979 = vmatmul.mubr.msk.bf16.vlgmr.msra.gmra.mrb[64].mxu1 %vm784_vm4, %v6205_v16  ;;  %5003 = vmatmul.mubr.msk.bf16.vlgmr.msra.gmra.mrb[60].mxu0 %vm784_vm4, %v6205_v16 }
 0xc72   : > { %4991 = vmatpush3.bf16.msra.mxu1 %v5272_v30  ;;  %4994 = vmatprep.mubr.msk.bf16.mxu1 %vm5617_vm5, %v5612_v1 }
 0xc73   : > { %4992 = vmatprep.subr.bf16.mxu1 %v5612_v1  ;;  %5016 = vmatprep.mubr.msk.f32.mxu0 %vm5617_vm5, %v5612_v1 }
 0xc76   : > { %4993 = vmatpush3.bf16.msra.mxu1 %v5273_v31 }
 0xc77   : > { %5006 = vmatprep.subr.bf16.mxu1 %v5612_v1 }
 0xc79   : > { %4995 = vmatmul.mubr.msk.bf16.vlgmr.msra.gmra.mrb[68].mxu1 %vm784_vm4, %v6205_v16 }
 0xc7a   : > { %5007 = vmatpush3.bf16.msra.mxu1 %v5274_v32  ;;  %5010 = vmatprep.mubr.msk.bf16.mxu1 %vm5617_vm5, %v5612_v1 }
 0xc7b   : > { %5008 = vmatprep.subr.bf16.mxu1 %v5612_v1 }
 0xc7e   : > { %5009 = vmatpush3.bf16.msra.mxu1 %v5275_v33 }
 0xc7f   : > { %5024 = vmatprep.subr.mxu1 %v5612_v1 }
 0xc81   : > { %5011 = vmatmul.mubr.msk.bf16.vlgmr.msra.gmra.mrb[72].mxu1 %vm784_vm4, %v6205_v16 }
 0xc82   : > { %5026 = vmatprep.mubr.msk.f32.mxu1 %vm5617_vm5, %v5612_v1 }
 0xd24   : > { %v2678_v34 = vpop.f32.mrb[48].mxu1  ;;  %v2782_v35 = vpop.f32.mrb[44].mxu0 }
 0xd25   : > { %v4924_v36 = vpop.f32.mrb[49].mxu1  ;;  %v4940_v37 = vpop.f32.mrb[45].mxu0 }
 0xd26   : > { %v2681_v38 = vpop.f32.mrb[50].mxu1  ;;  %v2785_v39 = vpop.f32.mrb[46].mxu0 }
 0xd27   : > { %v4925_v40 = vpop.f32.mrb[51].mxu1  ;;  %v4941_v41 = vpop.f32.mrb[47].mxu0 }
 0xd2c   : > { %v2730_v43 = vpop.f32.mrb[52].mxu1  ;;  %v2886_v44 = vpop.f32.mrb[48].mxu0 }
 0xd2d   : > { %v4932_v45 = vpop.f32.mrb[53].mxu1  ;;  %v4956_v46 = vpop.f32.mrb[49].mxu0  ;;  %5015 = vmatpush3.xpose.msk.msra.mxu0 %vm1520_vm6, %v2886_v44 }
 0xd2e   : > { %v2733_v47 = vpop.f32.mrb[54].mxu1  ;;  %v2889_v48 = vpop.f32.mrb[50].mxu0  ;;  %5019 = vmatprep.subr.mxu0 %v5612_v1 }
 0xd2f   : > { %v4933_v49 = vpop.f32.mrb[55].mxu1  ;;  %v4957_v50 = vpop.f32.mrb[51].mxu0 }
 0xd30   : > { %5017 = vmatmul.mubr.msk.f32.vlgmr.msra.gmra.mrb[64].mxu0 %vm1520_vm6, %v2678_v34 }
 0xd31   : > { %5021 = vmatprep.mubr.msk.f32.mxu0 %vm5617_vm5, %v5612_v1 }
 0xd34   : > { %v2834_v51 = vpop.f32.mrb[56].mxu1  ;;  %v2990_v52 = vpop.f32.mrb[52].mxu0 }
 0xd35   : > { %v4948_v53 = vpop.f32.mrb[57].mxu1  ;;  %v4972_v54 = vpop.f32.mrb[53].mxu0  ;;  %5025 = vmatpush3.xpose.msk.msra.mxu1 %vm1520_vm6, %v2990_v52 }
 0xd36   : > { %v2837_v56 = vpop.f32.mrb[58].mxu1  ;;  %v2993_v57 = vpop.f32.mrb[54].mxu0  ;;  %5034 = vmatprep.subr.mxu1 %v5612_v1 }
 0xd37   : > { %v4949_v58 = vpop.f32.mrb[59].mxu1  ;;  %v4973_v59 = vpop.f32.mrb[55].mxu0 }
 0xd38   : > { %5027 = vmatmul.mubr.msk.f32.vlgmr.msra.gmra.mrb[76].mxu1 %vm1520_vm6, %v2782_v35 }
 0xd39   : > { %5036 = vmatprep.mubr.msk.f32.mxu1 %vm5617_vm5, %v5612_v1 }
 0xd3c   : > { %v2938_v60 = vpop.f32.mrb[60].mxu1  ;;  %v3094_v61 = vpop.f32.mrb[56].mxu0 }
 0xd3d   : > { %v4964_v62 = vpop.f32.mrb[61].mxu1  ;;  %v4988_v63 = vpop.f32.mrb[57].mxu0  ;;  %5020 = vmatpush3.xpose.msk.msra.mxu0 %vm1520_vm6, %v2938_v60  ;;  %5035 = vmatpush3.msra.mxu1 %v3094_v61 }
 0xd3e   : > { %v2941_v0 = vpop.f32.mrb[62].mxu1  ;;  %v3097_v2 = vpop.f32.mrb[58].mxu0  ;;  %5029 = vmatprep.subr.mxu0 %v5612_v1  ;;  %5044 = vmatprep.subr.mxu1 %v5612_v1 }
 0xd3f   : > { %v4965_v3 = vpop.f32.mrb[63].mxu1  ;;  %v4989_v4 = vpop.f32.mrb[59].mxu0 }
 0xd40   : > { %5022 = vmatmul.mubr.msk.f32.vlgmr.msra.gmra.mrb[66].mxu0 %vm1520_vm6, %v2730_v43 }
 0xd41   : > { %5031 = vmatprep.mubr.msk.f32.mxu0 %vm5617_vm5, %v5612_v1 }
 0xd44   : > { %v3042_v5 = vpop.f32.mrb[64].mxu1  ;;  %v6291_v6 = vpop.f32.mrb[60].mxu0 }
 0xd45   : > { %v4980_v7 = vpop.f32.mrb[65].mxu1  ;;  %v5004_v8 = vpop.f32.mrb[61].mxu0  ;;  %5030 = vmatpush3.xpose.msk.msra.mxu0 %vm1520_vm6, %v3042_v5 }
 0xd46   : > { %v3045_v9 = vpop.f32.mrb[66].mxu1  ;;  %v3201_v10 = vpop.f32.mrb[62].mxu0  ;;  %5039 = vmatprep.subr.mxu0 %v5612_v1  ;;  %v2598_v7 = vld [vmem:[#allocation11 + $0x10] sm:$0xf] }
 0xd47   : > { %v4981_v11 = vpop.f32.mrb[67].mxu1  ;;  %v5005_v12 = vpop.f32.mrb[63].mxu0  ;;  %v3904_v8 = vsel %vm699_vm0, %v2598_v7, 0  ;;  %v2599_v9 = vld [vmem:[#allocation11 + $0x14] sm:$0xf] }
 0xd48   : > { %5032 = vmatmul.mubr.msk.f32.vlgmr.msra.gmra.mrb[68].mxu0 %vm1520_vm6, %v2834_v51  ;;  %v3950_v10 = vsel %vm699_vm0, %v2599_v9, 0  ;;  %v2600_v11 = vld [vmem:[#allocation11 + $0x18] sm:$0xf] }
 0xd49   : > { %5041 = vmatprep.mubr.msk.f32.mxu0 %vm5617_vm5, %v5612_v1 }
 0xd4c   : > { %v3146_v14 = vpop.f32.mrb[68].mxu1 }
 0xd4d   : > { %v4996_v15 = vpop.f32.mrb[69].mxu1  ;;  %5040 = vmatpush3.msra.mxu0 %v3146_v14 }
 0xd4e   : > { %v3149_v16 = vpop.f32.mrb[70].mxu1  ;;  %5049 = vmatprep.subr.mxu0 %v5612_v1 }
 0xd4f   : > { %v4997_v17 = vpop.f32.mrb[71].mxu1  ;;  %v3996_v16 = vsel %vm699_vm0, %v2600_v11, 0 }
 0xd54   : > { %v6299_v18 = vpop.f32.mrb[72].mxu1 }
 0xd55   : > { %v5012_v19 = vpop.f32.mrb[73].mxu1 }
 0xd56   : > { %v3253_v20 = vpop.f32.mrb[74].mxu1 }
 0xd57   : > { %v5013_v21 = vpop.f32.mrb[75].mxu1  ;;  %v2601_v20 = vld [vmem:[#allocation11 + $0x1c] sm:$0xf] }
 0xe03   : > { %v3328_v22 = vpop.f32.mrb[64].mxu0 }
 0xe04   : > { %v3329_v23 = vadd.f32 %v3328_v22, %v6103_v55  ;;  %v5018_v24 = vpop.f32.mrb[65].mxu0 }
 0xe05   : > { %v4042_v24 = vsel %vm699_vm0, %v2601_v20, 0 }
 0xe06   : > { %v3560_v25 = vsel %vm1520_vm6, %v3329_v23, -inf }
 0xe07   : > { %3561 = vmax.xlane.f32.xlu1 %v3560_v25 }
 0xe0b   : > { %v3480_v26 = vpop.f32.mrb[76].mxu1 }
 0xe0c   : > { %v3481_v27 = vadd.f32 %v3480_v26, %v6103_v55  ;;  %v5028_v42 = vpop.f32.mrb[77].mxu1 }
 0xe0e   : > { %v3566_v28 = vsel %vm1520_vm6, %v3481_v27, -inf }
 0xe0f   : > { %3567 = vmax.xlane.f32.xlu1 %v3566_v28 }
 0xe13   : > { %v3404_v29 = vpop.f32.mrb[66].mxu0 }
 0xe14   : > { %v3405_v30 = vadd.f32 %v3404_v29, %v6103_v55  ;;  %v5023_v31 = vpop.f32.mrb[67].mxu0 }
 0xe16   : > { %v3563_v32 = vsel %vm1520_vm6, %v3405_v30, -inf }
 0xe17   : > { %3564 = vmax.xlane.f32.xlu0 %v3563_v32 }
 0xe1b   : > { %v3556_v33 = vpop.f32.mrb[68].mxu0 }
 0xe1c   : > { %v3557_v34 = vadd.f32 %v3556_v33, %v6103_v55  ;;  %v5033_v35 = vpop.f32.mrb[69].mxu0 }
 0xe1e   : > { %v3569_v36 = vsel %vm1520_vm6, %v3557_v34, -inf }
 0xe1f   : > { %3570 = vmax.xlane.f32.xlu0 %v3569_v36 }
 0xe94   : > { %v3562_v37 = vpop.xlane.xlu1 %3561 }
 0xe95   : > { %v3572_v38 = vsub.f32 %v3329_v23, %v3562_v37 }
 0xe97   : > { %v3576_v39 = vmul.f32 1.442695, %v3572_v38 }
 0xe99   : > { %5304 = vpow2.f32 %v3576_v39 }
 0xe9c   : > { %v3568_v40 = vpop.xlane.xlu1 %3567 }
 0xe9d   : > { %v3574_v41 = vsub.f32 %v3481_v27, %v3568_v40 }
 0xe9f   : > { %v3580_v43 = vmul.f32 1.442695, %v3574_v41 }
 0xea1   : > { %5306 = vpow2.f32 %v3580_v43 }
 0xea3   : > { %v5305_v44 = vpop.eup %5304 }
 0xea4   : > { %v3565_v45 = vpop.xlane.xlu0 %3564  ;;  %v3584_v46 = vsel %vm1520_vm6, %v5305_v44, 0.0 }
 0xea5   : > { %v3573_v47 = vsub.f32 %v3405_v30, %v3565_v45  ;;  %3585 = vadd.xlane.f32.xlu1 %v3584_v46 }
 0xea7   : > { %v3578_v48 = vmul.f32 1.442695, %v3573_v47 }
 0xea9   : > { %5308 = vpow2.f32 %v3578_v48 }
 0xeab   : > { %v5307_v55 = vpop.eup %5306 }
 0xeac   : > { %v3571_v49 = vpop.xlane.xlu0 %3570  ;;  %v3590_v50 = vsel %vm1520_vm6, %v5307_v55, 0.0 }
 0xead   : > { %v3575_v51 = vsub.f32 %v3557_v34, %v3571_v49  ;;  %3591 = vadd.xlane.f32.xlu1 %v3590_v50 }
 0xeaf   : > { %v3582_v52 = vmul.f32 1.442695, %v3575_v51 }
 0xeb1   : > { %5310 = vpow2.f32 %v3582_v52 }
 0xeb3   : > { %v5309_v53 = vpop.eup %5308 }
 0xeb4   : > { %v3587_v54 = vsel %vm1520_vm6, %v5309_v53, 0.0 }
 0xeb5   : > { %3588 = vadd.xlane.f32.xlu0 %v3587_v54  ;;  %v5277_v54 = vld [vmem:[#allocation12 + $0x18] sm:$0xff]  }
 0xebb   : > { %v5311_v56 = vpop.eup %5310 }
 0xebc   : > { %v3593_v57 = vsel %vm1520_vm6, %v5311_v56, 0.0 }
 0xebd   : > { %3594 = vadd.xlane.f32.xlu0 %v3593_v57 }
 0xf32   : > { %v3586_v58 = vpop.xlane.xlu1 %3585 }
 0xf33   : > { %5312 = vrcp.f32 %v3586_v58 }
 0xf3a   : > { %v3592_v59 = vpop.xlane.xlu1 %3591 }
 0xf3b   : > { %5314 = vrcp.f32 %v3592_v59 }
 0xf3d   : > { %v5313_v60 = vpop.eup %5312 }
 0xf3e   : > { %v3600_v61 = vmul.f32 %v5313_v60, %v5305_v44 }
 0xf40   : > { %5037 = vmatmul.mubr.msk.f32.vlgmr.msra.gmra.mrb[78].mxu1 %vm1520_vm6, %v3600_v61  ;;  %v4584_v61 = vld [vmem:[%s6445_s10 + $0x1] ss:$0 sm:$0xff] }
 0xf41   : > { %5045 = vmatpush3.msra.mxu1 %v6291_v6  ;;  %5046 = vmatprep.mubr.msk.f32.mxu1 %vm5617_vm5, %v5612_v1 }
 0xf42   : > { %v3589_v62 = vpop.xlane.xlu0 %3588  ;;  %5054 = vmatprep.subr.bf16.mxu1 %v5612_v1 }
 0xf43   : > { %5316 = vrcp.f32 %v3589_v62 }
 0xf45   : > { %v5315_v63 = vpop.eup %5314 }
 0xf46   : > { %v3602_v0 = vmul.f32 %v5315_v63, %v5307_v55  ;;  %v4585_v63 = vld [vmem:[%s6446_s11 + $0x1] ss:$0 sm:$0xff] }
 0xf48   : > { %5047 = vmatmul.mubr.msk.f32.vlgmr.msra.gmra.mrb[80].mxu1 %vm1520_vm6, %v3602_v0 }
 0xf49   : > { %5056 = vmatprep.mubr.msk.bf16.mxu1 %vm5617_vm5, %v5612_v1  ;;  %5055 = vmatpush3.bf16.msra.mxu1 %v3904_v8 }
 0xf4a   : > { %v3595_v2 = vpop.xlane.xlu0 %3594  ;;  %5066 = vmatprep.subr.bf16.mxu1 %v5612_v1 }
 0xf4b   : > { %5318 = vrcp.f32 %v3595_v2 }
 0xf4d   : > { %v5317_v3 = vpop.eup %5316 }
 0xf4e   : > { %v3601_v4 = vmul.f32 %v5317_v3, %v5309_v53  ;;  %v5276_v53 = vld [vmem:[#allocation12 + $0x10] sm:$0xff]  }
 0xf50   : > { %5042 = vmatmul.mubr.msk.f32.vlgmr.msra.gmra.mrb[70].mxu0 %vm1520_vm6, %v3601_v4  ;;  %v5280_v4 = vld [vmem:[%s6449_s14 + $0x30] sm:$0xff]  }
 0xf51   : > { %5050 = vmatpush3.msra.mxu0 %v6299_v18  ;;  %5051 = vmatprep.mubr.msk.f32.mxu0 %vm5617_vm5, %v5612_v1 }
 0xf52   : > { %5060 = vmatprep.subr.bf16.mxu0 %v5612_v1 }
 0xf55   : > { %v5319_v5 = vpop.eup %5318 }
 0xf56   : > { %v3603_v6 = vmul.f32 %v5319_v5, %v5311_v56  ;;  %v5279_v56 = vld [vmem:[%s6449_s14 + $0x28] sm:$0xff]   ;;  %v5281_v5 = vld [vmem:[%s6449_s14 + $0x38] sm:$0xff]  }
 0xf58   : > { %5052 = vmatmul.mubr.msk.f32.vlgmr.msra.gmra.mrb[72].mxu0 %vm1520_vm6, %v3603_v6  ;;  %v4586_v6 = vld [vmem:[#allocation14 + $0x1] ss:$0 sm:$0xff] }
 0xf59   : > { %5062 = vmatprep.mubr.msk.bf16.mxu0 %vm5617_vm5, %v5612_v1  ;;  %5061 = vmatpush3.bf16.msra.mxu0 %v3950_v10 }
 0xf5a   : > { %5072 = vmatprep.subr.bf16.mxu0 %v5612_v1 }
0x1013   : > { %v3673_v12 = vpop.f32.mrb[78].mxu1 }
0x1014   : > { %v3896_v14 = vpack.c.bf16 %v3673_v12, %v3673_v12  ;;  %v5038_v15 = vpop.f32.mrb[79].mxu1 }
0x1015   : > { %v4590_v15 = vld [vmem:[%s6450_s15 + $0x1] ss:$0 sm:$0xff] }
0x1016   : > { %5057 = vmatmul.mubr.msk.bf16.vlgmr.msra.gmra.mrb[84].mxu1 %vm1520_vm6, %v3896_v14 }
0x1017   : > { %5067 = vmatpush3.bf16.msra.mxu1 %v3996_v16  ;;  %5068 = vmatprep.mubr.msk.bf16.mxu1 %vm5617_vm5, %v5612_v1 }
0x1018   : > { %5078 = vmatprep.subr.bf16.mxu1 %v5612_v1 }
0x101b   : > { %v3819_v17 = vpop.f32.mrb[80].mxu1 }
0x101c   : > { %v3898_v18 = vpack.c.bf16 %v3819_v17, %v3819_v17  ;;  %v5048_v19 = vpop.f32.mrb[81].mxu1 }
0x101e   : > { %5069 = vmatmul.mubr.msk.bf16.vlgmr.msra.gmra.mrb[88].mxu1 %vm1520_vm6, %v3898_v18 }
0x101f   : > { %5082 = vmatprep.mubr.msk.bf16.mxu1 %vm5617_vm5, %v5612_v1  ;;  %5079 = vmatpush3.bf16.msra.mxu1 %v5276_v53 }
0x1020   : > { %5080 = vmatprep.subr.bf16.mxu1 %v5612_v1 }
0x1023   : > { %v3746_v21 = vpop.f32.mrb[70].mxu0  ;;  %5081 = vmatpush3.bf16.msra.mxu1 %v5277_v54 }
0x1024   : > { %v3897_v22 = vpack.c.bf16 %v3746_v21, %v3746_v21  ;;  %v5043_v23 = vpop.f32.mrb[71].mxu0 }
0x1026   : > { %5063 = vmatmul.mubr.msk.bf16.vlgmr.msra.gmra.mrb[76].mxu0 %vm1520_vm6, %v3897_v22 }
0x1027   : > { %5073 = vmatpush3.bf16.msra.mxu0 %v4042_v24  ;;  %5074 = vmatprep.mubr.msk.bf16.mxu0 %vm5617_vm5, %v5612_v1 }
0x1028   : > { %5086 = vmatprep.subr.bf16.mxu0 %v5612_v1 }
0x102b   : > { %v3892_v25 = vpop.f32.mrb[72].mxu0 }
0x102c   : > { %v3899_v26 = vpack.c.bf16 %v3892_v25, %v3892_v25  ;;  %v5053_v27 = vpop.f32.mrb[73].mxu0 }
0x102e   : > { %5075 = vmatmul.mubr.msk.bf16.vlgmr.msra.gmra.mrb[80].mxu0 %vm1520_vm6, %v3899_v26 }
0x102f   : > { %5094 = vmatprep.mubr.msk.bf16.mxu0 %vm5617_vm5, %v5612_v1 }
0x10e9   : > { %v3940_v42 = vpop.f32.mrb[84].mxu1 }
0x10ea   : > { %v5058_v28 = vpop.f32.mrb[85].mxu1 }
0x10eb   : > { %v3943_v29 = vpop.f32.mrb[86].mxu1 }
0x10ec   : > { %v5059_v30 = vpop.f32.mrb[87].mxu1 }
0x10ed   : > { %v4596_v30 = vld [vmem:[%s6503_s2 + $0x1] ss:$0 sm:$0xff] }
0x10f1   : > { %v4032_v31 = vpop.f32.mrb[88].mxu1 }
0x10f2   : > { %v5070_v32 = vpop.f32.mrb[89].mxu1 }
0x10f3   : > { %v4035_v33 = vpop.f32.mrb[90].mxu1  ;;  %v4597_v32 = vld [vmem:[%s6504_s16 + $0x1] ss:$0 sm:$0xff] }
0x10f4   : > { %v5071_v34 = vpop.f32.mrb[91].mxu1 }
0x10f9   : > { %v3986_v35 = vpop.f32.mrb[76].mxu0 }
0x10fa   : > { %v4084_v36 = vadd.f32 %v3986_v35, %v3940_v42  ;;  %v5064_v37 = vpop.f32.mrb[77].mxu0 }
0x10fb   : > { %v3989_v38 = vpop.f32.mrb[78].mxu0 }
0x10fc   : > { %v5065_v39 = vpop.f32.mrb[79].mxu0  ;;  %v4085_v40 = vadd.f32 %v4084_v36, %v4032_v31 }
0x1101   : > { %v4078_v41 = vpop.f32.mrb[80].mxu0 }
0x1102   : > { %v4086_v43 = vadd.f32 %v4085_v40, %v4078_v41  ;;  %v5076_v44 = vpop.f32.mrb[81].mxu0 }
0x1103   : > { %v4081_v45 = vpop.f32.mrb[82].mxu0 }
0x1104   : > { %v5077_v46 = vpop.f32.mrb[83].mxu0  ;;  %v4087_v47 = vadd.f32 %v4086_v43, %v6201_v13  ;;  %v5278_v13 = vld [vmem:[%s6449_s14 + $0x20] sm:$0xff]  }
0x1105   : > { %5087 = vmatpush3.bf16.msra.mxu0 %v5278_v13 }
0x1106   : > { %v4088_v48 = vsel %vm784_vm4, %v4087_v47, 0.0  ;;  %5088 = vmatprep.subr.bf16.mxu0 %v5612_v1 }
0x1107   : > { %4089 = vadd.xlane.f32.xlu1 %v4088_v48 }
0x1109   : > { %5089 = vmatpush3.bf16.msra.mxu0 %v5279_v56 }
0x110a   : > { %5090 = vmatprep.subr.bf16.mxu0 %v5612_v1 }
0x110d   : > { %5091 = vmatpush3.bf16.msra.mxu0 %v5280_v4 }
0x110e   : > { %5092 = vmatprep.subr.bf16.mxu0 %v5612_v1 }
0x1111   : > { %5093 = vmatpush3.bf16.msra.mxu0 %v5281_v5 }
0x1194   : > { %v4090_v55 = vpop.xlane.xlu1 %4089 }
0x1195   : > { %v4091_v49 = vmul.f32 0.03125, %v4090_v55 }
0x1197   : > { %v4092_v50 = vsub.f32 %v4087_v47, %v4091_v49 }
0x1199   : > { %v4093_v51 = vmul.f32 %v4092_v50, %v4092_v50 }
0x119b   : > { %v4094_v52 = vsel %vm784_vm4, %v4093_v51, 0.0 }
0x119c   : > { %4095 = vadd.xlane.f32.xlu0 %v4094_v52 }
0x1229   : > { %v4096_v57 = vpop.xlane.xlu0 %4095 }
0x122a   : > { %v4097_v58 = vmul.f32 0.03125, %v4096_v57 }
0x122c   : > { %v4098_v59 = vadd.f32 1e-06, %v4097_v58 }
0x122e   : > { %5320 = vrsqrt.f32 %v4098_v59 }
0x1238   : > { %v5321_v60 = vpop.eup %5320 }
0x1239   : > { %v4100_v62 = vmul.f32 %v5321_v60, %v4092_v50 }
0x123b   : > { %v4107_v0 = vmul.f32 %v4584_v61, %v4100_v62 }
0x123d   : > { %v4114_v2 = vadd.f32 %v4585_v63, %v4107_v0 }
0x123f   : > { %v4115_v3 = vpack.c.bf16 %v4114_v2, %v4114_v2 }
0x1241   : > { %5083 = vmatmul.mubr.msk.bf16.vlgmr.msra.gmra.mrb[92].mxu1 %vm784_vm4, %v4115_v3 }
0x1314   : > { %v4171_v7 = vpop.f32.mrb[92].mxu1 }
0x1315   : > { %v4172_v8 = vadd.f32 %v4586_v6, %v4171_v7  ;;  %v5084_v9 = vpop.f32.mrb[93].mxu1 }
0x1316   : > { %v4174_v10 = vpop.f32.mrb[94].mxu1 }
0x1317   : > { %v4177_v11 = vmax.f32 %v4172_v8, 0.0  ;;  %v5085_v12 = vpop.f32.mrb[95].mxu1 }
0x1319   : > { %v4178_v14 = vpack.c.bf16 %v4177_v11, %v4177_v11 }
0x131b   : > { %5095 = vmatmul.mubr.msk.bf16.vlgmr.msra.gmra.mrb[84].mxu0 %vm2474_vm8, %v4178_v14 }
0x13ee   : > { %v4246_v1 = vpop.f32.mrb[84].mxu0 }
0x13ef   : > { %v4247_v16 = vadd.f32 %v4590_v15, %v4246_v1  ;;  %v5096_v17 = vpop.f32.mrb[85].mxu0 }
0x13f0   : > { %v4249_v18 = vpop.f32.mrb[86].mxu0 }
0x13f1   : > { %v5097_v19 = vpop.f32.mrb[87].mxu0  ;;  %v4252_v20 = vadd.f32 %v4247_v16, %v4114_v2 }
0x13f3   : > { %v4253_v21 = vsel %vm784_vm4, %v4252_v20, 0.0 }
0x13f4   : > { %4254 = vadd.xlane.f32.xlu1 %v4253_v21 }
0x1481   : > { %v4255_v22 = vpop.xlane.xlu1 %4254 }
0x1482   : > { %v4256_v23 = vmul.f32 0.03125, %v4255_v22 }
0x1484   : > { %v4257_v24 = vsub.f32 %v4252_v20, %v4256_v23 }
0x1486   : > { %v4258_v25 = vmul.f32 %v4257_v24, %v4257_v24 }
0x1488   : > { %v4259_v26 = vsel %vm784_vm4, %v4258_v25, 0.0 }
0x1489   : > { %4260 = vadd.xlane.f32.xlu0 %v4259_v26 }
0x1516   : > { %v4261_v27 = vpop.xlane.xlu0 %4260 }
0x1517   : > { %v4262_v42 = vmul.f32 0.03125, %v4261_v27 }
0x1519   : > { %v4263_v28 = vadd.f32 1e-06, %v4262_v42 }
0x151b   : > { %5322 = vrsqrt.f32 %v4263_v28 }
0x1525   : > { %v5323_v29 = vpop.eup %5322 }
0x1526   : > { %v4265_v31 = vmul.f32 %v5323_v29, %v4257_v24 }
0x1528   : > { %v4272_v33 = vmul.f32 %v4596_v30, %v4265_v31 }
0x152a   : > { %v4279_v34 = vadd.f32 %v4597_v32, %v4272_v33 }
0x152c   : > { %4280 = vst.msk [vmem:[%s675_s1] sm:$0xff] %vm784_vm4, %v4279_v34 }
0x152d   : > { %5533 = shalt.err (!%p5530_p2)
}
0x152e   : > { %s5534_s6 = scalar_lea.hbm %s6392_s18, 128  ;;  %s5538_s30 = scalar_lea.hbm %s6507_s19, 256 }
0x152f   : > { %p5535_p3 = scmp.ne.s32.totalorder %s6392_s18, %s5534_s6  ;;  %p5539_p7 = scmp.lt.u32.totalorder %s6392_s18, %s6507_s19 }
0x1530   : > { %p5540_p8 = scmp.lt.u32.totalorder %s5538_s30, %s5534_s6  ;;  %p5542_p13 = scmp.lt.u32.totalorder %s5534_s6, %s6392_s18 }
0x1531   : > { %p5536_p4 = pnand %p5535_p3, %p6508_p1 }
0x1532   : > { %p5541_p11 = por %p5540_p8, %p5539_p7 }
0x1533   : > { %p5537_p12 = pneg %p5536_p4 }
0x1534   : > { %p5543_p6 = por %p5542_p13, %p5541_p11 }
0x1536   : > { %p5544_p9 = pnand %p5543_p6, %p5537_p12 }
0x1538   : > { %5547 = shalt.err (!%p5544_p9)
}
0x1539   : > { %5126 = dma.vmem_to_hbm [thread:$0]  (%p6508_p1), %s6394_s17, 128, %s6392_s18, %s4282_s29  }
0x153a PF: > { %s6509_s24 = sld [smem:[#allocation24_spill]]  ;;  %s6510_s27 = sld [smem:[#allocation21_spill]] }
0x153b   : > { %s6511_s0 = sld [smem:[#allocation28_spill]] }
0x1540   : > { %p5168_p5 = scmp.ge.s32.totalorder %s6509_s24, 2  ;;  %s4307_s20 = sand.u32 1, %s6510_s27  }
0x1541   : > { %p6512_p10 = scmp.ne.s32.totalorder %s6511_s0, 0  ;;  %s4308_s26 = scalar_lea.sflag [#allocation5], %s4307_s20 }
0x1543   : > { %p5151_p0 = pnand %p5168_p5, %p6512_p10 }
0x1545   : > { %5581 = dma.done.wait (!%p5151_p0), %s4308_s26, 128  }
0x1546   : > { %5583 = vsyncadd (!%p5151_p0), %s4308_s26, 4294967168  ;;  %s6513_s30 = sld [smem:[#allocation25_spill]]  ;;  %s6514_s27 = sld [smem:[#allocation22_spill]] }
0x1547   : > { %s6515_s28 = sld [smem:[#allocation23_spill]]  ;;  %s6516_s29 = sld [smem:[#allocation26_spill]] }
0x154c   : > { %p32_p2 = scmp.ge.s32.totalorder %s6513_s30, 4  }
0x154e   :  { %34 = sbr.rel (!%p32_p2) target bundleno = 15 (0xf), region = 171 }
0x1555   :  { %4313 = vsyncpa [#allocation4], 1 }
0x1556   :  { %4315 = vsyncpa [#allocation4 + $0x1], 1 }
0x1557   :  { %4316 = vsyncpa [#allocation7], 1 }
0x1558   :  { %4317 = vsyncpa [#allocation10], 1 }
0x1559   :  { %4318 = vsyncpa [#allocation13], 1 }
0x155a   :  { %4319 = vsyncpa [#allocation5], 1 }
0x155b   :  { %4321 = vsyncpa [#allocation5 + $0x1], 1 }

</bundles_post_ra>
